<compile_context>
chip_gen: v5e
topology: v5e:2x2
jax: 0.10.0
libtpu: 0.0.40
codegen_flags: <defaults>
</compile_context>

<pallas_src>
import math
from functools import lru_cache

import numpy as np
import jax
import jax.numpy as jnp
from jax.experimental import pallas as pl
from jax.experimental.pallas import tpu as pltpu

# ----------------------------- configuration -------------------------------
VOCAB = 128          # multiple of 128 -> lane axis
EMBED = 128          # model dim D (full 128-lane vreg)
BEAM_SIZE = 2
BEAM_SQ = BEAM_SIZE * BEAM_SIZE
OUT_LANES = 128      # lane-dense candidate-slab width

# fairseq Dictionary default special indices
BOS_IDX, PAD_IDX, EOS_IDX, UNK_IDX = 0, 1, 2, 3

MAX_TARGET_POSITIONS = 32
MAX_LEN = MAX_TARGET_POSITIONS - 2
MAX_LEN_A, MAX_LEN_B = 1.4, 4.0
LEN_PENALTY = 1.0
UNK_PENALTY = 0.5
INIT_OUT_W_BOS = False
NEG_INF = float("-inf")

ROW_TILE = 256       # encoder row tile (bump to 512+ only for >few hundred rows)


# ----------------------------- Pallas kernels ------------------------------
def _encoder_kernel(x_ref, w_ref, out_ref):
    # out = tanh(X @ W_enc), bf16 MXU inputs, f32 accumulate.
    out_ref[...] = jnp.tanh(
        jnp.dot(x_ref[...].astype(jnp.bfloat16),
                w_ref[...].astype(jnp.bfloat16),
                preferred_element_type=jnp.float32))


@lru_cache(maxsize=None)
def _build_encoder_call(padded_rows):
    return pl.pallas_call(
        _encoder_kernel,
        grid=(padded_rows // ROW_TILE,),
        in_specs=[
            pl.BlockSpec((ROW_TILE, EMBED), lambda i: (i, 0)),
            pl.BlockSpec((EMBED, EMBED), lambda i: (0, 0)),   # W resident
        ],
        out_specs=pl.BlockSpec((ROW_TILE, EMBED), lambda i: (i, 0)),
        out_shape=jax.ShapeDtypeStruct((padded_rows, EMBED), jnp.float32),
        compiler_params=pltpu.CompilerParams(
            dimension_semantics=("parallel",)),
    )


@lru_cache(maxsize=None)
def _build_decode_step_call(n, t_cache, enc_rows):
    """Fused incremental decode step + determine_cands + candidate scoring.

    n        = bsz * beam_size rows (fixed for the whole generation)
    t_cache  = preallocated self-attention cache length
    enc_rows = bsz * src_len (beam-deduplicated encoder K/V rows)
    """
    D, V, K = EMBED, VOCAB, BEAM_SIZE
    scale = 1.0 / math.sqrt(D)

    def kernel(pos_ref, tok_ref, state_ref, embed_ref, selfk_ref, selfv_ref,
               enckt_ref, encv_ref, encb_ref, wpack_ref, wh_ref, wvoc_ref,
               bvoc_ref, slab_ref, newk_ref, newv_ref):
        f32, bf16 = jnp.float32, jnp.bfloat16
        pos = pos_ref[0]

        # ---- token embedding as a one-hot MXU matmul (gather-free) ----
        tok = tok_ref[...]                                           # (n,1) int32
        vcol = jax.lax.broadcasted_iota(jnp.int32, (n, V), 1)
        x = jnp.dot((vcol == tok).astype(bf16), embed_ref[...],
                    preferred_element_type=f32)                      # (n, D) f32
        xb = x.astype(bf16)

        # ---- fused q_self|k_self|v_self|q_enc projection: one (D,4D) matmul ----
        proj = jnp.dot(xb, wpack_ref[...], preferred_element_type=f32)  # (n,4D)
        q_s = proj[:, 0 * D:1 * D]
        new_k = proj[:, 1 * D:2 * D]
        new_v = proj[:, 2 * D:3 * D]
        q_e = proj[:, 3 * D:4 * D]

        # ---- self attention over the bf16 KV cache.  Current position is
        #      handled by patching a single score / context term, no (n,t,D)
        #      where-insert.  Elementwise math stays f32 (v5e-friendly).
        s_c = jnp.einsum("nqd,nkd->nqk", q_s[:, None, :].astype(bf16),
                         selfk_ref[...], preferred_element_type=f32) * scale
        kpos = jax.lax.broadcasted_iota(jnp.int32, (n, 1, t_cache), 2)
        s_c = jnp.where(kpos < pos, s_c, NEG_INF)        # cache rows < pos only
        s_new = (jnp.sum(q_s * new_k, axis=-1, keepdims=True) * scale)[:, :, None]
        m = jnp.maximum(jnp.max(s_c, axis=-1, keepdims=True), s_new)
        p_c = jnp.exp(s_c - m)
        p_new = jnp.exp(s_new - m)
        denom = jnp.sum(p_c, axis=-1, keepdims=True) + p_new
        inv = pl.reciprocal(denom, approx=True)
        ctx_c = jnp.einsum("nqk,nkd->nqd", p_c.astype(bf16), selfv_ref[...],
                           preferred_element_type=f32)
        ctx_s = ((ctx_c + p_new * new_v[:, None, :]) * inv)[:, 0, :]   # (n, D)

        # ---- encoder attention: beam-deduplicated K/V; cross-sentence routing
        #      and src-pad masking come in as an additive bias.
        se = (jnp.dot(q_e.astype(bf16), enckt_ref[...],
                      preferred_element_type=f32) * scale + encb_ref[...])
        me = jnp.max(se, axis=-1, keepdims=True)
        pe = jnp.exp(se - me)
        inve = pl.reciprocal(jnp.sum(pe, axis=-1, keepdims=True), approx=True)
        ctx_e = jnp.dot(pe.astype(bf16), encv_ref[...],
                        preferred_element_type=f32) * inve             # (n, D)

        # ---- hidden + vocab projection + log_softmax + penalties (f32) ----
        h = jnp.tanh(jnp.dot((x + ctx_s + ctx_e).astype(bf16), wh_ref[...],
                             preferred_element_type=f32))
        logits = jnp.dot(h.astype(bf16), wvoc_ref[...],
                         preferred_element_type=f32) + bvoc_ref[...]
        z = logits - jnp.max(logits, axis=-1, keepdims=True)
        lprobs = z - jnp.log(jnp.sum(jnp.exp(z), axis=-1, keepdims=True))
        lprobs = jnp.where(vcol == PAD_IDX, NEG_INF, lprobs)
        lprobs = jnp.where(vcol == UNK_IDX, lprobs - UNK_PENALTY, lprobs)

        # ---- fused beam bookkeeping (determine_cands + score accumulation +
        #      length-norm + finished-row masking), lane-dense slab layout:
        #        lanes [0,K)    cumulative candidate scores
        #        lanes [K,2K)   candidate token ids (as f32; exact for V<2^24)
        #        lanes [2K,3K)  candidate sentence scores
        prev = state_ref[:, 0:1]                       # out_scores[:, step-1]
        fin = state_ref[:, 1:2] > 0.5                  # beam already emitted EOS
        abs_sent = jnp.abs(state_ref[:, 2:3])          # |out_sent_scores|
        pos_f = pos.astype(f32)
        if LEN_PENALTY == 1.0:                         # trace-time branch
            norm = pos_f + 2.0
        else:
            norm = (pos_f + 2.0) ** LEN_PENALTY

        cur = lprobs
        lane = jax.lax.broadcasted_iota(jnp.int32, (n, OUT_LANES), 1)
        slab = jnp.zeros((n, OUT_LANES), f32)
        for k in range(K):
            best = jnp.max(cur, axis=-1, keepdims=True)
            idx = jnp.min(jnp.where(cur == best, vcol, V), axis=-1, keepdims=True)
            cum = best + prev
            tok_k = jnp.where(fin, EOS_IDX, idx).astype(f32)
            score_k = jnp.where(fin, NEG_INF, cum)
            sent_k = cum / norm
            sent_k = jnp.where(fin, abs_sent if k == 0 else NEG_INF, sent_k)
            slab = jnp.where(lane == k, score_k, slab)
            slab = jnp.where(lane == K + k, tok_k, slab)
            slab = jnp.where(lane == 2 * K + k, sent_k, slab)
            cur = jnp.where(vcol == idx, NEG_INF, cur)

        slab_ref[...] = slab                # single unmasked 128-lane store
        newk_ref[...] = new_k.astype(bf16)  # bf16 cache rows
        newv_ref[...] = new_v.astype(bf16)

    def _spec2(shape):
        return pl.BlockSpec(shape, lambda i, pos: (0, 0))

    def _spec3(shape):
        return pl.BlockSpec(shape, lambda i, pos: (0, 0, 0))

    grid_spec = pltpu.PrefetchScalarGridSpec(
        num_scalar_prefetch=1,                 # `pos` scalar lives in SMEM
        grid=(1,),
        in_specs=[
            _spec2((n, 1)),                    # prev token ids
            _spec2((n, 8)),                    # packed row state (prev/fin/sent)
            _spec2((V, D)),                    # bf16 embedding table
            _spec3((n, t_cache, D)),           # bf16 self-attn K cache
            _spec3((n, t_cache, D)),           # bf16 self-attn V cache
            _spec2((D, enc_rows)),             # bf16 encoder K (transposed, dedup)
            _spec2((enc_rows, D)),             # bf16 encoder V (dedup)
            _spec2((n, enc_rows)),             # f32 encoder additive bias/mask
            _spec2((D, 4 * D)),                # bf16 packed Wq_s|Wk_s|Wv_s|Wq_e
            _spec2((D, D)),                    # bf16 W_hidden
            _spec2((D, V)),                    # bf16 W_vocab
            _spec2((1, V)),                    # f32 b_vocab (post-accumulate add)
        ],
        out_specs=(
            _spec2((n, OUT_LANES)),            # lane-dense candidate slab
            _spec2((n, D)),                    # new self-attn K row (bf16)
            _spec2((n, D)),                    # new self-attn V row (bf16)
        ),
    )
    return pl.pallas_call(
        kernel,
        grid_spec=grid_spec,
        out_shape=(
            jax.ShapeDtypeStruct((n, OUT_LANES), jnp.float32),
            jax.ShapeDtypeStruct((n, D), jnp.bfloat16),
            jax.ShapeDtypeStruct((n, D), jnp.bfloat16),
        ),
        compiler_params=pltpu.CompilerParams(
            dimension_semantics=("arbitrary",)),
    )


# ------------------------ synthetic model parameters -----------------------
def init_params(key):
    ks = jax.random.split(key, 11)
    s = 1.0 / math.sqrt(EMBED)
    return {
        "embed": jax.random.normal(ks[0], (VOCAB, EMBED), jnp.float32) * 0.5,
        "W_enc": jax.random.normal(ks[1], (EMBED, EMBED), jnp.float32) * s,
        "Wq_self": jax.random.normal(ks[2], (EMBED, EMBED), jnp.float32) * s,
        "Wk_self": jax.random.normal(ks[3], (EMBED, EMBED), jnp.float32) * s,
        "Wv_self": jax.random.normal(ks[4], (EMBED, EMBED), jnp.float32) * s,
        "Wq_enc": jax.random.normal(ks[5], (EMBED, EMBED), jnp.float32) * s,
        "Wk_enc": jax.random.normal(ks[6], (EMBED, EMBED), jnp.float32) * s,
        "Wv_enc": jax.random.normal(ks[7], (EMBED, EMBED), jnp.float32) * s,
        "W_hidden": jax.random.normal(ks[8], (EMBED, EMBED), jnp.float32) * s,
        "W_vocab": jax.random.normal(ks[9], (EMBED, VOCAB), jnp.float32) * s,
        "b_vocab": jax.random.normal(ks[10], (1, VOCAB), jnp.float32) * 0.1,
    }


def _pack_decode_params(params):
    """Pre-cast / pack the per-step decode weights once (bf16 DMA per step)."""
    bf16 = jnp.bfloat16
    w_pack = jnp.concatenate(
        [params["Wq_self"], params["Wk_self"], params["Wv_self"],
         params["Wq_enc"]], axis=1).astype(bf16)                     # (D, 4D)
    return {
        "embed": params["embed"].astype(bf16),
        "w_pack": w_pack,
        "w_hidden": params["W_hidden"].astype(bf16),
        "w_vocab": params["W_vocab"].astype(bf16),
        "b_vocab": params["b_vocab"],     # stays f32 (added after f32 accumulate)
    }


def _make_enc_bias(bsz, src_tokens):
    """Additive bias that routes each beam row to its own sentence's encoder
    rows and masks source PAD positions (0 where allowed, -inf elsewhere)."""
    src_len = src_tokens.shape[1]
    row_sent = jnp.repeat(jnp.arange(bsz), BEAM_SIZE)[:, None]       # (n, 1)
    col_sent = jnp.repeat(jnp.arange(bsz), src_len)[None, :]         # (1, bsz*S)
    not_pad = (src_tokens != PAD_IDX).reshape(1, bsz * src_len)
    ok = jnp.logical_and(row_sent == col_sent, not_pad)
    return jnp.where(ok, 0.0, NEG_INF).astype(jnp.float32)


def forward_encoder(params, src_tokens):
    bsz, src_len = src_tokens.shape
    rows = bsz * src_len
    padded = ((rows + ROW_TILE - 1) // ROW_TILE) * ROW_TILE
    x = params["embed"][src_tokens].astype(jnp.float32).reshape(rows, EMBED)
    x = jnp.pad(x, ((0, padded - rows), (0, 0)))
    enc = _build_encoder_call(padded)(x, params["W_enc"])[:rows]
    # (S, B, D) time-major, fairseq convention
    return jnp.transpose(enc.reshape(bsz, src_len, EMBED), (1, 0, 2))


def get_score_norm(tgt_len):
    return float((tgt_len + 1) ** LEN_PENALTY)


# -------- pure-JAX reference of the fused decode step (mirrors kernel) ------
def _decode_step_ref(dp, prev_tok, pos, self_k, self_v, enc_kt, enc_v, enc_bias):
    f32, bf16 = jnp.float32, jnp.bfloat16
    t_cache = self_k.shape[1]
    scale = 1.0 / math.sqrt(EMBED)
    vcol = jnp.arange(VOCAB)[None, :]
    x = jnp.dot((vcol == prev_tok).astype(bf16), dp["embed"],
                preferred_element_type=f32)
    proj = jnp.dot(x.astype(bf16), dp["w_pack"], preferred_element_type=f32)
    q_s, new_k, new_v, q_e = (proj[:, i * EMBED:(i + 1) * EMBED] for i in range(4))

    s_c = jnp.einsum("nd,nkd->nk", q_s.astype(bf16), self_k,
                     preferred_element_type=f32) * scale
    kpos = jnp.arange(t_cache)[None, :]
    s_c = jnp.where(kpos < pos, s_c, NEG_INF)
    s_new = jnp.sum(q_s * new_k, axis=-1, keepdims=True) * scale
    m = jnp.maximum(jnp.max(s_c, axis=-1, keepdims=True), s_new)
    p_c = jnp.exp(s_c - m)
    p_new = jnp.exp(s_new - m)
    denom = jnp.sum(p_c, axis=-1, keepdims=True) + p_new
    ctx_s = (jnp.einsum("nk,nkd->nd", p_c.astype(bf16), self_v,
                        preferred_element_type=f32) + p_new * new_v) / denom

    se = jnp.dot(q_e.astype(bf16), enc_kt,
                 preferred_element_type=f32) * scale + enc_bias
    me = jnp.max(se, axis=-1, keepdims=True)
    pe = jnp.exp(se - me)
    ctx_e = (jnp.dot(pe.astype(bf16), enc_v, preferred_element_type=f32)
             / jnp.sum(pe, axis=-1, keepdims=True))

    h = jnp.tanh(jnp.dot((x + ctx_s + ctx_e).astype(bf16), dp["w_hidden"],
                         preferred_element_type=f32))
    logits = jnp.dot(h.astype(bf16), dp["w_vocab"],
                     preferred_element_type=f32) + dp["b_vocab"]
    lprobs = jax.nn.log_softmax(logits, axis=-1)
    lprobs = lprobs.at[:, PAD_IDX].set(NEG_INF)
    lprobs = lprobs.at[:, UNK_IDX].add(-UNK_PENALTY)
    scores, tokens = jax.lax.top_k(lprobs, BEAM_SIZE)
    return scores, tokens, new_k.astype(bf16), new_v.astype(bf16), lprobs


# ------------------- device-side beam search (single dispatch) --------------
def _beam_search_core_impl(params, src_tokens):
    bsz, src_len = src_tokens.shape
    n = bsz * BEAM_SIZE
    K = BEAM_SIZE
    t_max = min(int(src_len * MAX_LEN_A + MAX_LEN_B), MAX_LEN)
    enc_rows = bsz * src_len
    bf16 = jnp.bfloat16

    dp = _pack_decode_params(params)

    # encoder + beam-deduplicated encoder K/V (beams of a sentence share it)
    encoder_out = forward_encoder(params, src_tokens)                  # (S,B,D)
    enc_flat = jnp.transpose(encoder_out, (1, 0, 2)).reshape(enc_rows, EMBED)
    enc_kt = jnp.dot(enc_flat, params["Wk_enc"]).T.astype(bf16)        # (D, bsz*S)
    enc_vb = jnp.dot(enc_flat, params["Wv_enc"]).astype(bf16)          # (bsz*S, D)
    enc_bias = _make_enc_bias(bsz, src_tokens)                         # (n, bsz*S)

    decode_step = _build_decode_step_call(n, t_max, enc_rows)

    def run_decode(pos, prev_tok, state, self_k, self_v):
        return decode_step(
            jnp.reshape(pos, (1,)).astype(jnp.int32), prev_tok, state,
            dp["embed"], self_k, self_v, enc_kt, enc_vb, enc_bias,
            dp["w_pack"], dp["w_hidden"], dp["w_vocab"], dp["b_vocab"])

    # fixed-shape output buffers and bf16 KV caches (N never shrinks)
    out_tokens = jnp.full((n, t_max + 1), PAD_IDX, jnp.int32)
    out_tokens = out_tokens.at[:, 0].set(BOS_IDX if INIT_OUT_W_BOS else EOS_IDX)
    out_scores = jnp.full((n, t_max), NEG_INF, jnp.float32)
    self_k = jnp.zeros((n, t_max, EMBED), bf16)
    self_v = jnp.zeros((n, t_max, EMBED), bf16)
    rows = jnp.arange(n)

    # ---- step 0 ----
    state0 = jnp.zeros((n, 8), jnp.float32)
    slab, nk, nv = run_decode(jnp.int32(0), out_tokens[:, 0:1], state0,
                              self_k, self_v)
    self_k = jax.lax.dynamic_update_slice(self_k, nk[:, None, :], (0, 0, 0))
    self_v = jax.lax.dynamic_update_slice(self_v, nv[:, None, :], (0, 0, 0))
    cand_scores = slab[:, :K]
    cand_tokens = slab[:, K:2 * K].astype(jnp.int32)
    beam_pos = rows % K
    out_tokens = out_tokens.at[:, 1].set(cand_tokens[rows, beam_pos])
    out_scores = out_scores.at[:, 0].set(cand_scores[rows, beam_pos])
    out_sent_scores = out_scores[:, 0] / get_score_norm(1)
    fin_pos = out_tokens[:, 1] == EOS_IDX
    sent_done = jnp.zeros((bsz,), jnp.bool_)

    # ---- steps 1 .. t_max-1, fully on-device ----
    def cond(carry):
        step, _, _, _, _, done, _, _ = carry
        return jnp.logical_and(step < t_max, jnp.logical_not(jnp.all(done)))

    def body(carry):
        (step, out_tokens, out_scores, out_sent_scores, fin_pos, sent_done,
         self_k, self_v) = carry

        # finished sentences are frozen (masked) instead of removed.
        sent_done = jnp.logical_or(
            sent_done, jnp.all(fin_pos.reshape(bsz, K), axis=-1))
        active = jnp.repeat(jnp.logical_not(sent_done), K)             # (N,)

        prev_tok = jax.lax.dynamic_slice_in_dim(out_tokens, step, 1, axis=1)
        prev_scores = jax.lax.dynamic_slice_in_dim(out_scores, step - 1, 1, axis=1)
        state = jnp.concatenate(
            [prev_scores, fin_pos.astype(jnp.float32)[:, None],
             out_sent_scores[:, None], jnp.zeros((n, 5), jnp.float32)], axis=1)

        slab, nk, nv = run_decode(step, prev_tok, state, self_k, self_v)
        self_k = jax.lax.dynamic_update_slice(self_k, nk[:, None, :], (0, step, 0))
        self_v = jax.lax.dynamic_update_slice(self_v, nv[:, None, :], (0, step, 0))

        # slab already carries cum scores / tokens / sentence scores with the
        # finished-row masking and length-norm applied in-kernel.
        ct = slab[:, K:2 * K].astype(jnp.int32).reshape(bsz, BEAM_SQ)
        cs = slab[:, :K].reshape(bsz, BEAM_SQ)
        css = slab[:, 2 * K:3 * K].reshape(bsz, BEAM_SQ)
        top_css, top_cands = jax.lax.top_k(css, K)
        top_tok = jnp.take_along_axis(ct, top_cands, axis=1).reshape(n)
        top_sc = jnp.take_along_axis(cs, top_cands, axis=1).reshape(n)
        top_css = top_css.reshape(n)

        base = jnp.repeat(jnp.arange(bsz), K) * K
        new_order = base + top_cands.reshape(n) // K
        new_order = jnp.where(active, new_order, rows)   # identity for done rows

        out_tokens = out_tokens[new_order]
        out_scores = out_scores[new_order]
        self_k = self_k[new_order]
        self_v = self_v[new_order]
        # TODO(synk): at larger N, fold this cache gather into the next step's
        # kernel via a row-tiled grid + scalar-prefetched new_order index_map.

        old_tok = jax.lax.dynamic_slice_in_dim(out_tokens, step + 1, 1, axis=1)[:, 0]
        tok_col = jnp.where(active, top_tok, old_tok)
        out_tokens = jax.lax.dynamic_update_slice(
            out_tokens, tok_col[:, None], (0, step + 1))
        old_sc = jax.lax.dynamic_slice_in_dim(out_scores, step, 1, axis=1)[:, 0]
        sc_col = jnp.where(active, top_sc, old_sc)
        out_scores = jax.lax.dynamic_update_slice(
            out_scores, sc_col[:, None], (0, step))

        out_sent_scores = jnp.where(active, top_css, out_sent_scores)
        fin_pos = jnp.where(active, tok_col == EOS_IDX, fin_pos)

        return (step + 1, out_tokens, out_scores, out_sent_scores, fin_pos,
                sent_done, self_k, self_v)

    carry = (jnp.int32(1), out_tokens, out_scores, out_sent_scores, fin_pos,
             sent_done, self_k, self_v)
    carry = jax.lax.while_loop(cond, body, carry)
    _, out_tokens, out_scores, out_sent_scores, _, sent_done, _, _ = carry
    return out_tokens, out_scores, out_sent_scores, sent_done


_beam_search_core = jax.jit(_beam_search_core_impl)


# ----------------------------- beam generator ------------------------------
def beam_generate(params, src_tokens):
    bsz, src_len = src_tokens.shape
    max_tgt_len = min(int(src_len * MAX_LEN_A + MAX_LEN_B), MAX_LEN)

    out_tokens, out_scores, out_sent_scores, sent_done = _beam_search_core(
        params, src_tokens)

    # single device -> host sync for the whole generation
    out_tokens = np.asarray(out_tokens).reshape(bsz, BEAM_SIZE, max_tgt_len + 1)
    out_scores = np.asarray(out_scores).reshape(bsz, BEAM_SIZE, max_tgt_len)
    out_sent_scores = np.asarray(out_sent_scores).reshape(bsz, BEAM_SIZE)
    sent_done = np.asarray(sent_done)

    finalized = []
    for i in range(bsz):
        toks, scores, ss = out_tokens[i], out_scores[i], out_sent_scores[i]
        if bool(sent_done[i]):
            order = np.argsort(np.abs(ss))      # == (-abs).argsort(descending)
            finalized.append((jnp.asarray(toks[order]),
                              jnp.asarray(scores[order]),
                              jnp.asarray(-np.abs(ss)[order])))
        else:
            finalized.append((jnp.asarray(toks), jnp.asarray(scores),
                              jnp.asarray(ss)))
    return finalized, max_tgt_len


# --------------------------------- main -------------------------------------
if __name__ == "__main__":
    key = jax.random.PRNGKey(0)
    pkey, tkey, ckey = jax.random.split(key, 3)
    params = init_params(pkey)

    bsz, src_len = 2, 8
    src_tokens = jax.random.randint(tkey, (bsz, src_len), 4, VOCAB, dtype=jnp.int32)

    # ---- sanity: fused Pallas decode-step kernel vs mirrored pure-JAX ref ----
    n = bsz * BEAM_SIZE
    t_max = min(int(src_len * MAX_LEN_A + MAX_LEN_B), MAX_LEN)
    enc_rows = bsz * src_len
    dp = _pack_decode_params(params)
    kk = jax.random.split(ckey, 5)
    prev_tok = jax.random.randint(kk[0], (n, 1), 4, VOCAB, dtype=jnp.int32)
    test_sk = (jax.random.normal(kk[1], (n, t_max, EMBED), jnp.float32) * 0.3
               ).astype(jnp.bfloat16)
    test_sv = (jax.random.normal(kk[2], (n, t_max, EMBED), jnp.float32) * 0.3
               ).astype(jnp.bfloat16)
    test_ek = jax.random.normal(kk[3], (enc_rows, EMBED), jnp.float32) * 0.3
    test_ev = jax.random.normal(kk[4], (enc_rows, EMBED), jnp.float32) * 0.3
    enc_kt = test_ek.T.astype(jnp.bfloat16)
    enc_vb = test_ev.astype(jnp.bfloat16)
    enc_bias = _make_enc_bias(bsz, src_tokens)
    state0 = jnp.zeros((n, 8), jnp.float32)
    pos = 3

    slab, nk, nv = _build_decode_step_call(n, t_max, enc_rows)(
        jnp.full((1,), pos, jnp.int32), prev_tok, state0, dp["embed"],
        test_sk, test_sv, enc_kt, enc_vb, enc_bias,
        dp["w_pack"], dp["w_hidden"], dp["w_vocab"], dp["b_vocab"])
    k_scores = np.asarray(slab[:, :BEAM_SIZE])
    k_tokens = np.asarray(slab[:, BEAM_SIZE:2 * BEAM_SIZE]).astype(np.int32)
    k_sent = np.asarray(slab[:, 2 * BEAM_SIZE:3 * BEAM_SIZE])

    r_scores, r_tokens, r_nk, r_nv, r_lprobs = _decode_step_ref(
        dp, prev_tok, pos, test_sk, test_sv, enc_kt, enc_vb, enc_bias)
    assert np.allclose(k_scores, np.asarray(r_scores), atol=1e-2, rtol=1e-2)
    assert np.allclose(k_sent, k_scores / float(pos + 2), atol=1e-5)
    assert np.allclose(np.asarray(nk.astype(jnp.float32)),
                       np.asarray(r_nk.astype(jnp.float32)), atol=2e-2, rtol=2e-2)
    assert np.allclose(np.asarray(nv.astype(jnp.float32)),
                       np.asarray(r_nv.astype(jnp.float32)), atol=2e-2, rtol=2e-2)
    picked = np.take_along_axis(np.asarray(r_lprobs), k_tokens, axis=1)
    assert np.allclose(picked, k_scores, atol=1e-2)   # kernel picked (near-)top tokens

    # ---- full beam generation (single jitted dispatch, one host sync) -------
    finalized, max_tgt_len = beam_generate(params, src_tokens)

    for entry in finalized:
        assert entry is not None
        toks, scores, sent_scores = entry
        jax.block_until_ready(toks)
        jax.block_until_ready(scores)
        jax.block_until_ready(sent_scores)
        assert toks.shape == (BEAM_SIZE, max_tgt_len + 1)
        assert scores.shape == (BEAM_SIZE, max_tgt_len)
        assert sent_scores.shape == (BEAM_SIZE,)

    print("KERNEL_OK")
</pallas_src>

<mosaic_0001>
module attributes {stable_mosaic.version = 11 : i64} {
  func.func @kernel(%arg0: i32, %arg1: memref<1xi32, #tpu.memory_space<smem>>, %arg2: memref<4x1xi32, #tpu.memory_space<vmem>>, %arg3: memref<4x8xf32, #tpu.memory_space<vmem>>, %arg4: memref<128x128xbf16, #tpu.memory_space<vmem>>, %arg5: memref<4x15x128xbf16, #tpu.memory_space<vmem>>, %arg6: memref<4x15x128xbf16, #tpu.memory_space<vmem>>, %arg7: memref<128x16xbf16, #tpu.memory_space<vmem>>, %arg8: memref<16x128xbf16, #tpu.memory_space<vmem>>, %arg9: memref<4x16xf32, #tpu.memory_space<vmem>>, %arg10: memref<128x512xbf16, #tpu.memory_space<vmem>>, %arg11: memref<128x128xbf16, #tpu.memory_space<vmem>>, %arg12: memref<128x128xbf16, #tpu.memory_space<vmem>>, %arg13: memref<1x128xf32, #tpu.memory_space<vmem>>, %arg14: memref<4x128xf32, #tpu.memory_space<vmem>>, %arg15: memref<4x128xbf16, #tpu.memory_space<vmem>>, %arg16: memref<4x128xbf16, #tpu.memory_space<vmem>>) attributes {dimension_semantics = [#tpu.dimension_semantics<arbitrary>], iteration_bounds = array<i64: 1>, scalar_prefetch = 1 : i64, scratch_operands = 0 : i64, tpu.core_type = #tpu.core_type<tc>, window_params = [{pipeline_mode = #tpu.pipeline_mode<synchronous>, transform_indices = @transform_0, window_bounds = array<i64: 4, 1>}, {pipeline_mode = #tpu.pipeline_mode<synchronous>, transform_indices = @transform_1, window_bounds = array<i64: 4, 8>}, {pipeline_mode = #tpu.pipeline_mode<synchronous>, transform_indices = @transform_2, window_bounds = array<i64: 128, 128>}, {pipeline_mode = #tpu.pipeline_mode<synchronous>, transform_indices = @transform_3, window_bounds = array<i64: 4, 15, 128>}, {pipeline_mode = #tpu.pipeline_mode<synchronous>, transform_indices = @transform_4, window_bounds = array<i64: 4, 15, 128>}, {pipeline_mode = #tpu.pipeline_mode<synchronous>, transform_indices = @transform_5, window_bounds = array<i64: 128, 16>}, {pipeline_mode = #tpu.pipeline_mode<synchronous>, transform_indices = @transform_6, window_bounds = array<i64: 16, 128>}, {pipeline_mode = #tpu.pipeline_mode<synchronous>, transform_indices = @transform_7, window_bounds = array<i64: 4, 16>}, {pipeline_mode = #tpu.pipeline_mode<synchronous>, transform_indices = @transform_8, window_bounds = array<i64: 128, 512>}, {pipeline_mode = #tpu.pipeline_mode<synchronous>, transform_indices = @transform_9, window_bounds = array<i64: 128, 128>}, {pipeline_mode = #tpu.pipeline_mode<synchronous>, transform_indices = @transform_10, window_bounds = array<i64: 128, 128>}, {pipeline_mode = #tpu.pipeline_mode<synchronous>, transform_indices = @transform_11, window_bounds = array<i64: 1, 128>}, {pipeline_mode = #tpu.pipeline_mode<synchronous>, transform_indices = @transform_12, window_bounds = array<i64: 4, 128>}, {pipeline_mode = #tpu.pipeline_mode<synchronous>, transform_indices = @transform_13, window_bounds = array<i64: 4, 128>}, {pipeline_mode = #tpu.pipeline_mode<synchronous>, transform_indices = @transform_14, window_bounds = array<i64: 4, 128>}]} {
    %c0 = arith.constant 0 : index
    %0 = memref.load %arg1[%c0] : memref<1xi32, #tpu.memory_space<smem>>
    %c0_0 = arith.constant 0 : index
    %c0_1 = arith.constant 0 : index
    %1 = vector.load %arg2[%c0_0, %c0_1] : memref<4x1xi32, #tpu.memory_space<vmem>>, vector<4x1xi32>
    %2 = tpu.iota {dimensions = array<i32: 1>} : vector<4x128xi32>
    %3 = vector.broadcast %1 : vector<4x1xi32> to vector<4x128xi32>
    %4 = arith.cmpi eq, %2, %3 : vector<4x128xi32>
    %5 = arith.extui %4 : vector<4x128xi1> to vector<4x128xi32>
    %6 = arith.sitofp %5 : vector<4x128xi32> to vector<4x128xf32>
    %7 = arith.truncf %6 : vector<4x128xf32> to vector<4x128xbf16>
    %c0_2 = arith.constant 0 : index
    %c0_3 = arith.constant 0 : index
    %8 = vector.load %arg4[%c0_2, %c0_3] : memref<128x128xbf16, #tpu.memory_space<vmem>>, vector<128x128xbf16>
    %cst = arith.constant dense<0.000000e+00> : vector<4x128xf32>
    %9 = tpu.matmul %7, %8, %cst {dimension_numbers = #tpu.dot_dimension_numbers<[1], [0], [0], [1], [0, 0, 1, 1], [], []>} : vector<4x128xbf16>, vector<128x128xbf16>, vector<4x128xf32> -> vector<4x128xf32>
    %10 = arith.truncf %9 : vector<4x128xf32> to vector<4x128xbf16>
    %c0_4 = arith.constant 0 : index
    %c0_5 = arith.constant 0 : index
    %11 = vector.load %arg10[%c0_4, %c0_5] : memref<128x512xbf16, #tpu.memory_space<vmem>>, vector<128x512xbf16>
    %cst_6 = arith.constant dense<0.000000e+00> : vector<4x512xf32>
    %12 = tpu.matmul %10, %11, %cst_6 {dimension_numbers = #tpu.dot_dimension_numbers<[1], [0], [0], [1], [0, 0, 1, 1], [], []>} : vector<4x128xbf16>, vector<128x512xbf16>, vector<4x512xf32> -> vector<4x512xf32>
    %13 = vector.extract_strided_slice %12 {offsets = [0, 0], sizes = [4, 128], strides = [1, 1]} : vector<4x512xf32> to vector<4x128xf32>
    %14 = vector.extract_strided_slice %12 {offsets = [0, 128], sizes = [4, 128], strides = [1, 1]} : vector<4x512xf32> to vector<4x128xf32>
    %15 = vector.extract_strided_slice %12 {offsets = [0, 256], sizes = [4, 128], strides = [1, 1]} : vector<4x512xf32> to vector<4x128xf32>
    %16 = vector.extract_strided_slice %12 {offsets = [0, 384], sizes = [4, 128], strides = [1, 1]} : vector<4x512xf32> to vector<4x128xf32>
    %17 = vector.shape_cast %13 : vector<4x128xf32> to vector<4x1x128xf32>
    %18 = arith.truncf %17 : vector<4x1x128xf32> to vector<4x1x128xbf16>
    %c0_7 = arith.constant 0 : index
    %c0_8 = arith.constant 0 : index
    %c0_9 = arith.constant 0 : index
    %19 = vector.load %arg5[%c0_7, %c0_8, %c0_9] : memref<4x15x128xbf16, #tpu.memory_space<vmem>>, vector<4x15x128xbf16>
    "tpu.trace_start"() <{level = 10 : i32, message = "nqd,nkd->nqk"}> : () -> ()
    %cst_10 = arith.constant dense<0.000000e+00> : vector<4x1x15xf32>
    %20 = tpu.matmul %18, %19, %cst_10 {dimension_numbers = #tpu.dot_dimension_numbers<[2], [2], [1], [1], [0, 0, 0, 1, 1, 1], [0], [0]>} : vector<4x1x128xbf16>, vector<4x15x128xbf16>, vector<4x1x15xf32> -> vector<4x1x15xf32>
    "tpu.trace_stop"() : () -> ()
    %cst_11 = arith.constant 0.0883883461 : f32
    %21 = vector.broadcast %cst_11 : f32 to vector<4x1x15xf32>
    %22 = arith.mulf %20, %21 : vector<4x1x15xf32>
    %23 = tpu.iota {dimensions = array<i32: 2>} : vector<4x1x15xi32>
    %24 = vector.broadcast %0 : i32 to vector<4x1x15xi32>
    %25 = arith.cmpi slt, %23, %24 : vector<4x1x15xi32>
    %cst_12 = arith.constant 0xFF800000 : f32
    %26 = vector.broadcast %cst_12 : f32 to vector<4x1x15xf32>
    %27 = arith.select %25, %22, %26 : vector<4x1x15xi1>, vector<4x1x15xf32>
    %28 = arith.mulf %13, %14 : vector<4x128xf32>
    %cst_13 = arith.constant dense<0.000000e+00> : vector<4xf32>
    %29 = vector.multi_reduction <add>, %28, %cst_13 [1] : vector<4x128xf32> to vector<4xf32>
    %30 = vector.shape_cast %29 : vector<4xf32> to vector<4x1xf32>
    %cst_14 = arith.constant 0.0883883461 : f32
    %31 = vector.broadcast %cst_14 : f32 to vector<4x1xf32>
    %32 = arith.mulf %30, %31 : vector<4x1xf32>
    %33 = vector.shape_cast %32 : vector<4x1xf32> to vector<4x1x1xf32>
    %cst_15 = arith.constant dense<0xFF800000> : vector<4x1xf32>
    %34 = vector.multi_reduction <maximumf>, %27, %cst_15 [2] : vector<4x1x15xf32> to vector<4x1xf32>
    %35 = vector.shape_cast %34 : vector<4x1xf32> to vector<4x1x1xf32>
    %36 = arith.maximumf %35, %33 : vector<4x1x1xf32>
    %37 = vector.broadcast %36 : vector<4x1x1xf32> to vector<4x1x15xf32>
    %38 = arith.subf %27, %37 : vector<4x1x15xf32>
    %39 = math.exp %38 : vector<4x1x15xf32>
    %40 = arith.subf %33, %36 : vector<4x1x1xf32>
    %41 = math.exp %40 : vector<4x1x1xf32>
    %cst_16 = arith.constant dense<0.000000e+00> : vector<4x1xf32>
    %42 = vector.multi_reduction <add>, %39, %cst_16 [2] : vector<4x1x15xf32> to vector<4x1xf32>
    %43 = vector.shape_cast %42 : vector<4x1xf32> to vector<4x1x1xf32>
    %44 = arith.addf %43, %41 : vector<4x1x1xf32>
    %45 = tpu.reciprocal %44 {approx = true} : vector<4x1x1xf32> -> vector<4x1x1xf32>
    %46 = arith.truncf %39 : vector<4x1x15xf32> to vector<4x1x15xbf16>
    %c0_17 = arith.constant 0 : index
    %c0_18 = arith.constant 0 : index
    %c0_19 = arith.constant 0 : index
    %47 = vector.load %arg6[%c0_17, %c0_18, %c0_19] : memref<4x15x128xbf16, #tpu.memory_space<vmem>>, vector<4x15x128xbf16>
    "tpu.trace_start"() <{level = 10 : i32, message = "nqk,nkd->nqd"}> : () -> ()
    %cst_20 = arith.constant dense<0.000000e+00> : vector<4x1x128xf32>
    %48 = tpu.matmul %46, %47, %cst_20 {dimension_numbers = #tpu.dot_dimension_numbers<[2], [1], [1], [2], [0, 0, 0, 1, 1, 2], [0], [0]>} : vector<4x1x15xbf16>, vector<4x15x128xbf16>, vector<4x1x128xf32> -> vector<4x1x128xf32>
    "tpu.trace_stop"() : () -> ()
    %49 = vector.shape_cast %15 : vector<4x128xf32> to vector<4x1x128xf32>
    %50 = vector.broadcast %41 : vector<4x1x1xf32> to vector<4x1x128xf32>
    %51 = arith.mulf %50, %49 : vector<4x1x128xf32>
    %52 = arith.addf %48, %51 : vector<4x1x128xf32>
    %53 = vector.broadcast %45 : vector<4x1x1xf32> to vector<4x1x128xf32>
    %54 = arith.mulf %52, %53 : vector<4x1x128xf32>
    %55 = vector.shape_cast %54 : vector<4x1x128xf32> to vector<4x128xf32>
    %56 = arith.truncf %16 : vector<4x128xf32> to vector<4x128xbf16>
    %c0_21 = arith.constant 0 : index
    %c0_22 = arith.constant 0 : index
    %57 = vector.load %arg7[%c0_21, %c0_22] : memref<128x16xbf16, #tpu.memory_space<vmem>>, vector<128x16xbf16>
    %cst_23 = arith.constant dense<0.000000e+00> : vector<4x16xf32>
    %58 = tpu.matmul %56, %57, %cst_23 {dimension_numbers = #tpu.dot_dimension_numbers<[1], [0], [0], [1], [0, 0, 1, 1], [], []>} : vector<4x128xbf16>, vector<128x16xbf16>, vector<4x16xf32> -> vector<4x16xf32>
    %cst_24 = arith.constant 0.0883883461 : f32
    %59 = vector.broadcast %cst_24 : f32 to vector<4x16xf32>
    %60 = arith.mulf %58, %59 : vector<4x16xf32>
    %c0_25 = arith.constant 0 : index
    %c0_26 = arith.constant 0 : index
    %61 = vector.load %arg9[%c0_25, %c0_26] : memref<4x16xf32, #tpu.memory_space<vmem>>, vector<4x16xf32>
    %62 = arith.addf %60, %61 : vector<4x16xf32>
    %cst_27 = arith.constant dense<0xFF800000> : vector<4xf32>
    %63 = vector.multi_reduction <maximumf>, %62, %cst_27 [1] : vector<4x16xf32> to vector<4xf32>
    %64 = vector.shape_cast %63 : vector<4xf32> to vector<4x1xf32>
    %65 = vector.broadcast %64 : vector<4x1xf32> to vector<4x16xf32>
    %66 = arith.subf %62, %65 : vector<4x16xf32>
    %67 = math.exp %66 : vector<4x16xf32>
    %cst_28 = arith.constant dense<0.000000e+00> : vector<4xf32>
    %68 = vector.multi_reduction <add>, %67, %cst_28 [1] : vector<4x16xf32> to vector<4xf32>
    %69 = vector.shape_cast %68 : vector<4xf32> to vector<4x1xf32>
    %70 = tpu.reciprocal %69 {approx = true} : vector<4x1xf32> -> vector<4x1xf32>
    %71 = arith.truncf %67 : vector<4x16xf32> to vector<4x16xbf16>
    %c0_29 = arith.constant 0 : index
    %c0_30 = arith.constant 0 : index
    %72 = vector.load %arg8[%c0_29, %c0_30] : memref<16x128xbf16, #tpu.memory_space<vmem>>, vector<16x128xbf16>
    %cst_31 = arith.constant dense<0.000000e+00> : vector<4x128xf32>
    %73 = tpu.matmul %71, %72, %cst_31 {dimension_numbers = #tpu.dot_dimension_numbers<[1], [0], [0], [1], [0, 0, 1, 1], [], []>} : vector<4x16xbf16>, vector<16x128xbf16>, vector<4x128xf32> -> vector<4x128xf32>
    %74 = vector.broadcast %70 : vector<4x1xf32> to vector<4x128xf32>
    %75 = arith.mulf %73, %74 : vector<4x128xf32>
    %76 = arith.addf %9, %55 : vector<4x128xf32>
    %77 = arith.addf %76, %75 : vector<4x128xf32>
    %78 = arith.truncf %77 : vector<4x128xf32> to vector<4x128xbf16>
    %c0_32 = arith.constant 0 : index
    %c0_33 = arith.constant 0 : index
    %79 = vector.load %arg11[%c0_32, %c0_33] : memref<128x128xbf16, #tpu.memory_space<vmem>>, vector<128x128xbf16>
    %cst_34 = arith.constant dense<0.000000e+00> : vector<4x128xf32>
    %80 = tpu.matmul %78, %79, %cst_34 {dimension_numbers = #tpu.dot_dimension_numbers<[1], [0], [0], [1], [0, 0, 1, 1], [], []>} : vector<4x128xbf16>, vector<128x128xbf16>, vector<4x128xf32> -> vector<4x128xf32>
    %81 = math.tanh %80 : vector<4x128xf32>
    %82 = arith.truncf %81 : vector<4x128xf32> to vector<4x128xbf16>
    %c0_35 = arith.constant 0 : index
    %c0_36 = arith.constant 0 : index
    %83 = vector.load %arg12[%c0_35, %c0_36] : memref<128x128xbf16, #tpu.memory_space<vmem>>, vector<128x128xbf16>
    %cst_37 = arith.constant dense<0.000000e+00> : vector<4x128xf32>
    %84 = tpu.matmul %82, %83, %cst_37 {dimension_numbers = #tpu.dot_dimension_numbers<[1], [0], [0], [1], [0, 0, 1, 1], [], []>} : vector<4x128xbf16>, vector<128x128xbf16>, vector<4x128xf32> -> vector<4x128xf32>
    %c0_38 = arith.constant 0 : index
    %c0_39 = arith.constant 0 : index
    %85 = vector.load %arg13[%c0_38, %c0_39] : memref<1x128xf32, #tpu.memory_space<vmem>>, vector<1x128xf32>
    %86 = vector.broadcast %85 : vector<1x128xf32> to vector<4x128xf32>
    %87 = arith.addf %84, %86 : vector<4x128xf32>
    %cst_40 = arith.constant dense<0xFF800000> : vector<4xf32>
    %88 = vector.multi_reduction <maximumf>, %87, %cst_40 [1] : vector<4x128xf32> to vector<4xf32>
    %89 = vector.shape_cast %88 : vector<4xf32> to vector<4x1xf32>
    %90 = vector.broadcast %89 : vector<4x1xf32> to vector<4x128xf32>
    %91 = arith.subf %87, %90 : vector<4x128xf32>
    %92 = math.exp %91 : vector<4x128xf32>
    %cst_41 = arith.constant dense<0.000000e+00> : vector<4xf32>
    %93 = vector.multi_reduction <add>, %92, %cst_41 [1] : vector<4x128xf32> to vector<4xf32>
    %94 = vector.shape_cast %93 : vector<4xf32> to vector<4x1xf32>
    %95 = math.log %94 : vector<4x1xf32>
    %96 = vector.broadcast %95 : vector<4x1xf32> to vector<4x128xf32>
    %97 = arith.subf %91, %96 : vector<4x128xf32>
    %c1_i32 = arith.constant 1 : i32
    %98 = vector.broadcast %c1_i32 : i32 to vector<4x128xi32>
    %99 = arith.cmpi eq, %2, %98 : vector<4x128xi32>
    %cst_42 = arith.constant 0xFF800000 : f32
    %100 = vector.broadcast %cst_42 : f32 to vector<4x128xf32>
    %101 = arith.select %99, %100, %97 : vector<4x128xi1>, vector<4x128xf32>
    %c3_i32 = arith.constant 3 : i32
    %102 = vector.broadcast %c3_i32 : i32 to vector<4x128xi32>
    %103 = arith.cmpi eq, %2, %102 : vector<4x128xi32>
    %cst_43 = arith.constant 5.000000e-01 : f32
    %104 = vector.broadcast %cst_43 : f32 to vector<4x128xf32>
    %105 = arith.subf %101, %104 : vector<4x128xf32>
    %106 = arith.select %103, %105, %101 : vector<4x128xi1>, vector<4x128xf32>
    %c0_44 = arith.constant 0 : index
    %c0_45 = arith.constant 0 : index
    %107 = vector.load %arg3[%c0_44, %c0_45] : memref<4x8xf32, #tpu.memory_space<vmem>>, vector<4x1xf32>
    %c0_46 = arith.constant 0 : index
    %c1 = arith.constant 1 : index
    %108 = vector.load %arg3[%c0_46, %c1] : memref<4x8xf32, #tpu.memory_space<vmem>>, vector<4x1xf32>
    %cst_47 = arith.constant 5.000000e-01 : f32
    %109 = vector.broadcast %cst_47 : f32 to vector<4x1xf32>
    %110 = arith.cmpf ogt, %108, %109 : vector<4x1xf32>
    %c0_48 = arith.constant 0 : index
    %c2 = arith.constant 2 : index
    %111 = vector.load %arg3[%c0_48, %c2] : memref<4x8xf32, #tpu.memory_space<vmem>>, vector<4x1xf32>
    %112 = math.absf %111 : vector<4x1xf32>
    %113 = arith.sitofp %0 : i32 to f32
    %cst_49 = arith.constant 2.000000e+00 : f32
    %114 = arith.addf %113, %cst_49 : f32
    %115 = tpu.iota {dimensions = array<i32: 1>} : vector<4x128xi32>
    %cst_50 = arith.constant 0.000000e+00 : f32
    %116 = vector.broadcast %cst_50 : f32 to vector<4x128xf32>
    %cst_51 = arith.constant dense<0xFF800000> : vector<4xf32>
    %117 = vector.multi_reduction <maximumf>, %106, %cst_51 [1] : vector<4x128xf32> to vector<4xf32>
    %118 = vector.shape_cast %117 : vector<4xf32> to vector<4x1xf32>
    %119 = vector.broadcast %118 : vector<4x1xf32> to vector<4x128xf32>
    %120 = arith.cmpf oeq, %106, %119 : vector<4x128xf32>
    %c128_i32 = arith.constant 128 : i32
    %121 = vector.broadcast %c128_i32 : i32 to vector<4x128xi32>
    %122 = arith.select %120, %2, %121 : vector<4x128xi1>, vector<4x128xi32>
    %cst_52 = arith.constant dense<2147483647> : vector<4xi32>
    %123 = vector.multi_reduction <minsi>, %122, %cst_52 [1] : vector<4x128xi32> to vector<4xi32>
    %124 = vector.shape_cast %123 : vector<4xi32> to vector<4x1xi32>
    %125 = arith.addf %118, %107 : vector<4x1xf32>
    %c2_i32 = arith.constant 2 : i32
    %126 = vector.broadcast %c2_i32 : i32 to vector<4x1xi32>
    %127 = arith.select %110, %126, %124 : vector<4x1xi1>, vector<4x1xi32>
    %128 = arith.sitofp %127 : vector<4x1xi32> to vector<4x1xf32>
    %cst_53 = arith.constant 0xFF800000 : f32
    %129 = vector.broadcast %cst_53 : f32 to vector<4x1xf32>
    %130 = arith.select %110, %129, %125 : vector<4x1xi1>, vector<4x1xf32>
    %131 = vector.broadcast %114 : f32 to vector<4x1xf32>
    %132 = arith.divf %125, %131 : vector<4x1xf32>
    %133 = arith.select %110, %112, %132 : vector<4x1xi1>, vector<4x1xf32>
    %c0_i32 = arith.constant 0 : i32
    %134 = vector.broadcast %c0_i32 : i32 to vector<4x128xi32>
    %135 = arith.cmpi eq, %115, %134 : vector<4x128xi32>
    %136 = vector.shape_cast %130 : vector<4x1xf32> to vector<4x1xf32>
    %137 = vector.broadcast %136 : vector<4x1xf32> to vector<4x128xf32>
    %138 = arith.select %135, %137, %116 : vector<4x128xi1>, vector<4x128xf32>
    %c2_i32_54 = arith.constant 2 : i32
    %139 = vector.broadcast %c2_i32_54 : i32 to vector<4x128xi32>
    %140 = arith.cmpi eq, %115, %139 : vector<4x128xi32>
    %141 = vector.shape_cast %128 : vector<4x1xf32> to vector<4x1xf32>
    %142 = vector.broadcast %141 : vector<4x1xf32> to vector<4x128xf32>
    %143 = arith.select %140, %142, %138 : vector<4x128xi1>, vector<4x128xf32>
    %c4_i32 = arith.constant 4 : i32
    %144 = vector.broadcast %c4_i32 : i32 to vector<4x128xi32>
    %145 = arith.cmpi eq, %115, %144 : vector<4x128xi32>
    %146 = vector.shape_cast %133 : vector<4x1xf32> to vector<4x1xf32>
    %147 = vector.broadcast %146 : vector<4x1xf32> to vector<4x128xf32>
    %148 = arith.select %145, %147, %143 : vector<4x128xi1>, vector<4x128xf32>
    %149 = vector.broadcast %124 : vector<4x1xi32> to vector<4x128xi32>
    %150 = arith.cmpi eq, %2, %149 : vector<4x128xi32>
    %cst_55 = arith.constant 0xFF800000 : f32
    %151 = vector.broadcast %cst_55 : f32 to vector<4x128xf32>
    %152 = arith.select %150, %151, %106 : vector<4x128xi1>, vector<4x128xf32>
    %cst_56 = arith.constant dense<0xFF800000> : vector<4xf32>
    %153 = vector.multi_reduction <maximumf>, %152, %cst_56 [1] : vector<4x128xf32> to vector<4xf32>
    %154 = vector.shape_cast %153 : vector<4xf32> to vector<4x1xf32>
    %155 = vector.broadcast %154 : vector<4x1xf32> to vector<4x128xf32>
    %156 = arith.cmpf oeq, %152, %155 : vector<4x128xf32>
    %c128_i32_57 = arith.constant 128 : i32
    %157 = vector.broadcast %c128_i32_57 : i32 to vector<4x128xi32>
    %158 = arith.select %156, %2, %157 : vector<4x128xi1>, vector<4x128xi32>
    %cst_58 = arith.constant dense<2147483647> : vector<4xi32>
    %159 = vector.multi_reduction <minsi>, %158, %cst_58 [1] : vector<4x128xi32> to vector<4xi32>
    %160 = vector.shape_cast %159 : vector<4xi32> to vector<4x1xi32>
    %161 = arith.addf %154, %107 : vector<4x1xf32>
    %c2_i32_59 = arith.constant 2 : i32
    %162 = vector.broadcast %c2_i32_59 : i32 to vector<4x1xi32>
    %163 = arith.select %110, %162, %160 : vector<4x1xi1>, vector<4x1xi32>
    %164 = arith.sitofp %163 : vector<4x1xi32> to vector<4x1xf32>
    %cst_60 = arith.constant 0xFF800000 : f32
    %165 = vector.broadcast %cst_60 : f32 to vector<4x1xf32>
    %166 = arith.select %110, %165, %161 : vector<4x1xi1>, vector<4x1xf32>
    %167 = vector.broadcast %114 : f32 to vector<4x1xf32>
    %168 = arith.divf %161, %167 : vector<4x1xf32>
    %cst_61 = arith.constant 0xFF800000 : f32
    %169 = vector.broadcast %cst_61 : f32 to vector<4x1xf32>
    %170 = arith.select %110, %169, %168 : vector<4x1xi1>, vector<4x1xf32>
    %c1_i32_62 = arith.constant 1 : i32
    %171 = vector.broadcast %c1_i32_62 : i32 to vector<4x128xi32>
    %172 = arith.cmpi eq, %115, %171 : vector<4x128xi32>
    %173 = vector.shape_cast %166 : vector<4x1xf32> to vector<4x1xf32>
    %174 = vector.broadcast %173 : vector<4x1xf32> to vector<4x128xf32>
    %175 = arith.select %172, %174, %148 : vector<4x128xi1>, vector<4x128xf32>
    %c3_i32_63 = arith.constant 3 : i32
    %176 = vector.broadcast %c3_i32_63 : i32 to vector<4x128xi32>
    %177 = arith.cmpi eq, %115, %176 : vector<4x128xi32>
    %178 = vector.shape_cast %164 : vector<4x1xf32> to vector<4x1xf32>
    %179 = vector.broadcast %178 : vector<4x1xf32> to vector<4x128xf32>
    %180 = arith.select %177, %179, %175 : vector<4x128xi1>, vector<4x128xf32>
    %c5_i32 = arith.constant 5 : i32
    %181 = vector.broadcast %c5_i32 : i32 to vector<4x128xi32>
    %182 = arith.cmpi eq, %115, %181 : vector<4x128xi32>
    %183 = vector.shape_cast %170 : vector<4x1xf32> to vector<4x1xf32>
    %184 = vector.broadcast %183 : vector<4x1xf32> to vector<4x128xf32>
    %185 = arith.select %182, %184, %180 : vector<4x128xi1>, vector<4x128xf32>
    %c0_64 = arith.constant 0 : index
    %c0_65 = arith.constant 0 : index
    %186 = vector.load %arg14[%c0_64, %c0_65] : memref<4x128xf32, #tpu.memory_space<vmem>>, vector<4x128xf32>
    tpu.vector_store %arg14[%c0_64, %c0_65], %185 {strides = array<i32>} : memref<4x128xf32, #tpu.memory_space<vmem>>, vector<4x128xf32>,
    %187 = arith.truncf %14 : vector<4x128xf32> to vector<4x128xbf16>
    %c0_66 = arith.constant 0 : index
    %c0_67 = arith.constant 0 : index
    %188 = vector.load %arg15[%c0_66, %c0_67] : memref<4x128xbf16, #tpu.memory_space<vmem>>, vector<4x128xbf16>
    tpu.vector_store %arg15[%c0_66, %c0_67], %187 {strides = array<i32>} : memref<4x128xbf16, #tpu.memory_space<vmem>>, vector<4x128xbf16>,
    %189 = arith.truncf %15 : vector<4x128xf32> to vector<4x128xbf16>
    %c0_68 = arith.constant 0 : index
    %c0_69 = arith.constant 0 : index
    %190 = vector.load %arg16[%c0_68, %c0_69] : memref<4x128xbf16, #tpu.memory_space<vmem>>, vector<4x128xbf16>
    tpu.vector_store %arg16[%c0_68, %c0_69], %189 {strides = array<i32>} : memref<4x128xbf16, #tpu.memory_space<vmem>>, vector<4x128xbf16>,
    return
  }
  func.func @transform_0(%arg0: i32, %arg1: memref<1xi32, #tpu.memory_space<smem>>) -> (i32, i32) {
    %c0_i32 = arith.constant 0 : i32
    %c0_i32_0 = arith.constant 0 : i32
    %c0_i32_1 = arith.constant 0 : i32
    return %c0_i32, %c0_i32_0 : i32, i32
  }
  func.func @transform_1(%arg0: i32, %arg1: memref<1xi32, #tpu.memory_space<smem>>) -> (i32, i32) {
    %c0_i32 = arith.constant 0 : i32
    %c0_i32_0 = arith.constant 0 : i32
    %c0_i32_1 = arith.constant 0 : i32
    return %c0_i32, %c0_i32_0 : i32, i32
  }
  func.func @transform_2(%arg0: i32, %arg1: memref<1xi32, #tpu.memory_space<smem>>) -> (i32, i32) {
    %c0_i32 = arith.constant 0 : i32
    %c0_i32_0 = arith.constant 0 : i32
    %c0_i32_1 = arith.constant 0 : i32
    return %c0_i32, %c0_i32_0 : i32, i32
  }
  func.func @transform_3(%arg0: i32, %arg1: memref<1xi32, #tpu.memory_space<smem>>) -> (i32, i32, i32) {
    %c0_i32 = arith.constant 0 : i32
    %c0_i32_0 = arith.constant 0 : i32
    %c0_i32_1 = arith.constant 0 : i32
    %c0_i32_2 = arith.constant 0 : i32
    return %c0_i32, %c0_i32_0, %c0_i32_1 : i32, i32, i32
  }
  func.func @transform_4(%arg0: i32, %arg1: memref<1xi32, #tpu.memory_space<smem>>) -> (i32, i32, i32) {
    %c0_i32 = arith.constant 0 : i32
    %c0_i32_0 = arith.constant 0 : i32
    %c0_i32_1 = arith.constant 0 : i32
    %c0_i32_2 = arith.constant 0 : i32
    return %c0_i32, %c0_i32_0, %c0_i32_1 : i32, i32, i32
  }
  func.func @transform_5(%arg0: i32, %arg1: memref<1xi32, #tpu.memory_space<smem>>) -> (i32, i32) {
    %c0_i32 = arith.constant 0 : i32
    %c0_i32_0 = arith.constant 0 : i32
    %c0_i32_1 = arith.constant 0 : i32
    return %c0_i32, %c0_i32_0 : i32, i32
  }
  func.func @transform_6(%arg0: i32, %arg1: memref<1xi32, #tpu.memory_space<smem>>) -> (i32, i32) {
    %c0_i32 = arith.constant 0 : i32
    %c0_i32_0 = arith.constant 0 : i32
    %c0_i32_1 = arith.constant 0 : i32
    return %c0_i32, %c0_i32_0 : i32, i32
  }
  func.func @transform_7(%arg0: i32, %arg1: memref<1xi32, #tpu.memory_space<smem>>) -> (i32, i32) {
    %c0_i32 = arith.constant 0 : i32
    %c0_i32_0 = arith.constant 0 : i32
    %c0_i32_1 = arith.constant 0 : i32
    return %c0_i32, %c0_i32_0 : i32, i32
  }
  func.func @transform_8(%arg0: i32, %arg1: memref<1xi32, #tpu.memory_space<smem>>) -> (i32, i32) {
    %c0_i32 = arith.constant 0 : i32
    %c0_i32_0 = arith.constant 0 : i32
    %c0_i32_1 = arith.constant 0 : i32
    return %c0_i32, %c0_i32_0 : i32, i32
  }
  func.func @transform_9(%arg0: i32, %arg1: memref<1xi32, #tpu.memory_space<smem>>) -> (i32, i32) {
    %c0_i32 = arith.constant 0 : i32
    %c0_i32_0 = arith.constant 0 : i32
    %c0_i32_1 = arith.constant 0 : i32
    return %c0_i32, %c0_i32_0 : i32, i32
  }
  func.func @transform_10(%arg0: i32, %arg1: memref<1xi32, #tpu.memory_space<smem>>) -> (i32, i32) {
    %c0_i32 = arith.constant 0 : i32
    %c0_i32_0 = arith.constant 0 : i32
    %c0_i32_1 = arith.constant 0 : i32
    return %c0_i32, %c0_i32_0 : i32, i32
  }
  func.func @transform_11(%arg0: i32, %arg1: memref<1xi32, #tpu.memory_space<smem>>) -> (i32, i32) {
    %c0_i32 = arith.constant 0 : i32
    %c0_i32_0 = arith.constant 0 : i32
    %c0_i32_1 = arith.constant 0 : i32
    return %c0_i32, %c0_i32_0 : i32, i32
  }
  func.func @transform_12(%arg0: i32, %arg1: memref<1xi32, #tpu.memory_space<smem>>) -> (i32, i32) {
    %c0_i32 = arith.constant 0 : i32
    %c0_i32_0 = arith.constant 0 : i32
    %c0_i32_1 = arith.constant 0 : i32
    return %c0_i32, %c0_i32_0 : i32, i32
  }
  func.func @transform_13(%arg0: i32, %arg1: memref<1xi32, #tpu.memory_space<smem>>) -> (i32, i32) {
    %c0_i32 = arith.constant 0 : i32
    %c0_i32_0 = arith.constant 0 : i32
    %c0_i32_1 = arith.constant 0 : i32
    return %c0_i32, %c0_i32_0 : i32, i32
  }
  func.func @transform_14(%arg0: i32, %arg1: memref<1xi32, #tpu.memory_space<smem>>) -> (i32, i32) {
    %c0_i32 = arith.constant 0 : i32
    %c0_i32_0 = arith.constant 0 : i32
    %c0_i32_1 = arith.constant 0 : i32
    return %c0_i32, %c0_i32_0 : i32, i32
  }
}

</mosaic_0001>

<bundles_post_ra>
// kernel: tpu_custom_call.1
= control target key start
LH: loop header
LB: loop body
LE: loop exit
PB: predicated region body
PF: predicated region fallthrough
CT: control target
= control target key end

     0   :  { %22 = vsyncpa [#allocation5], 0  ;;  %s2111_s0 = inlined_call_operand.<no memory space> [shape: s32[1], index: 0, kind: input, shape index: {}]   ;;  %s2112_s1 = inlined_call_operand.vmem [shape: s32[4,1], index: 1, kind: input, shape index: {}]   ;;  %s2113_s2 = inlined_call_operand.vmem [shape: f32[4,8], index: 2, kind: input, shape index: {}]   ;;  %s2114_s3 = inlined_call_operand.vmem [shape: bf16[128,128], index: 3, kind: input, shape index: {}]   ;;  %s2115_s4 = inlined_call_operand.vmem [shape: bf16[4,15,128], index: 4, kind: input, shape index: {}]   ;;  %s2116_s5 = inlined_call_operand.vmem [shape: bf16[4,15,128], index: 5, kind: input, shape index: {}]   ;;  %s2117_s6 = inlined_call_operand.vmem [shape: bf16[128,16], index: 6, kind: input, shape index: {}]   ;;  %s2118_s7 = inlined_call_operand.vmem [shape: bf16[16,128], index: 7, kind: input, shape index: {}]   ;;  %s2119_s8 = inlined_call_operand.vmem [shape: f32[4,16], index: 8, kind: input, shape index: {}]   ;;  %s2120_s9 = inlined_call_operand.hbm [shape: bf16[128,512], index: 9, kind: input, shape index: {}]   ;;  %s2121_s10 = inlined_call_operand.vmem [shape: bf16[128,128], index: 10, kind: input, shape index: {}]   ;;  %s2122_s11 = inlined_call_operand.hbm [shape: bf16[128,128], index: 11, kind: input, shape index: {}]   ;;  %s2123_s12 = inlined_call_operand.vmem [shape: f32[1,128], index: 12, kind: input, shape index: {}]   ;;  %s2124_s13 = inlined_call_operand.hbm [shape: f32[4,128], index: 13, kind: output, shape index: {0}]   ;;  %s2125_s14 = inlined_call_operand.hbm [shape: bf16[4,128], index: 14, kind: output, shape index: {1}]   ;;  %s2126_s15 = inlined_call_operand.hbm [shape: bf16[4,128], index: 15, kind: output, shape index: {2}]  }
   0x1   :  { %23 = vsyncpa [#allocation8], 0 }
   0x2   :  { %24 = vsyncpa [#allocation6], 0 }
   0x3   :  { %25 = vsyncpa [#allocation11], 0  ;;  %s46_s20 = sshll.u32 %s2120_s9, 4  ;;  %s1782_s21 = smov [#allocation4]   ;;  %s47_s20 = int_to_ptr.hbm [resolvable:$true] %s46_s20 }
   0x4   :  { %s48_s22 = sshll.u32 %s1782_s21, 4  ;;  %s61_s25 = sshll.u32 %s2122_s11, 4  ;;  %s49_s22 = int_to_ptr.vmem [resolvable:$true] %s48_s22  ;;  %s62_s25 = int_to_ptr.hbm [resolvable:$true] %s61_s25 }
   0x5   :  { %s1783_s26 = smov 256   ;;  %s1784_s27 = smov 16  }
   0x6   :  { %54 = dma.hbm_to_vmem [thread:$0]  %s47_s20, 4096, %s49_s22, [#allocation5], %s1783_s26, %s1783_s26, %s1784_s27  }
   0x7   :  { %s1785_s28 = smov [#allocation7]   ;;  %s1786_s30 = smov 64  }
   0x8   :  { %s63_s29 = sshll.u32 %s1785_s28, 4  ;;  %s1787_s16 = smov 4   ;;  %s64_s29 = int_to_ptr.vmem [resolvable:$true] %s63_s29 }
   0x9   :  { %69 = dma.hbm_to_vmem [thread:$0]  %s62_s25, 1024, %s64_s29, [#allocation8], %s1786_s30, %s1786_s30, %s1787_s16  }
   0xa   :  { %1774 = dma.done.wait [#allocation5], 4096  }
   0xb   :  { %1775 = vsyncadd [#allocation5], 4294963200 }
   0xc   :  { %1776 = dma.done.wait [#allocation8], 1024  }
   0xd   :  { %1777 = vsyncadd [#allocation8], 4294966272  ;;  %v1788_v0 = vmov 0   ;;  %v82_v1 = vld [vmem:[%s2112_s1] sm:$0xf]  ;;  %v1532_v2 = vld [vmem:[%s2114_s3 + $0x38] sm:$0xff]  ;;  %s1039_s1 = scvt.s32.f32 %s2111_s0 }
   0xe   :  { %1613 = vset.pattern.permute.xlu0 %v1788_v0  ;;  %156 = vmatpush.bf16.msra.mxu0 %v1532_v2  ;;  %v1531_v3 = vld [vmem:[%s2114_s3 + $0x30] sm:$0xff]  ;;  %v1530_v4 = vld [vmem:[%s2114_s3 + $0x28] sm:$0xff]  ;;  %v1529_v5 = vld [vmem:[%s2114_s3 + $0x20] sm:$0xff]  ;;  %vm520_vm2 = vcmask 1043456   ;;  %vm627_vm3 = vcmask 1046528   ;;  %vm628_vm4 = vcmask 1047552  }
   0xf   :  { %86 = vperm.xlu0 %1613, %v82_v1   ;;  %v1528_v6 = vld [vmem:[%s2114_s3 + $0x18] sm:$0xff]  ;;  %v1527_v7 = vld [vmem:[%s2114_s3 + $0x10] sm:$0xff]  ;;  %v1526_v8 = vld [vmem:[%s2114_s3 + $0x8] sm:$0xff]  ;;  %vm534_vm6 = vcmask 114688   ;;  %vm623_vm7 = vcmask 121856   ;;  %vm847_vm8 = vcmask 1041409  }
  0x10   :  { %v1525_v9 = vld [vmem:[%s2114_s3] sm:$0xff]  ;;  %v1563_v11 = vld [vmem:[#allocation4 + $0xec] sm:$0xf0]  ;;  %v1375_v14 = vld [vmem:[#allocation4 + $0xf0] sm:$0xf0]  ;;  %vm804_vm9 = vcmask 125952  }
  0x11   :  { %v1373_v10 = vld [vmem:[#allocation4 + $0xe0] sm:$0xf]  ;;  %v1561_v12 = vld [vmem:[#allocation4 + $0xe4] sm:$0xf]  ;;  %v1381_v15 = vld [vmem:[#allocation4 + $0xe8] sm:$0xf] }
  0x12   :  { %157 = vmatpush.bf16.msra.mxu0 %v1531_v3  ;;  %v1374_v13 = vor.u32 %v1563_v11, %v1373_v10  ;;  %v1564_v16 = vld [vmem:[#allocation4 + $0xf4] sm:$0xf0]  ;;  %v1378_v17 = vor.u32 %v1561_v12, %v1375_v14  ;;  %v1562_v19 = vld [vmem:[#allocation4 + $0xec] sm:$0xf]  ;;  %v1383_v20 = vld [vmem:[#allocation4 + $0xf8] sm:$0xf0] }
  0x13   :  { %v1382_v18 = vor.u32 %v1564_v16, %v1381_v15  ;;  %v1357_v21 = vld [vmem:[#allocation4 + $0xc0] sm:$0xf]  ;;  %v1386_v22 = vor.u32 %v1562_v19, %v1383_v20  ;;  %v1559_v23 = vld [vmem:[#allocation4 + $0xcc] sm:$0xf0]  ;;  %v1557_v24 = vld [vmem:[#allocation4 + $0xc4] sm:$0xf] }
  0x14   :  { %362 = vmatpush.bf16.msra.mxu1 %v1374_v13  ;;  %v1359_v25 = vld [vmem:[#allocation4 + $0xd0] sm:$0xf0]  ;;  %375 = vmatpush.bf16.msra.mxu2 %v1378_v17  ;;  %v1358_v26 = vor.u32 %v1559_v23, %v1357_v21  ;;  %v1365_v28 = vld [vmem:[#allocation4 + $0xc8] sm:$0xf]  ;;  %v1560_v29 = vld [vmem:[#allocation4 + $0xd4] sm:$0xf0] }
  0x15   :  { %388 = vmatpush.bf16.msra.mxu3 %v1382_v18  ;;  %v1362_v27 = vor.u32 %v1557_v24, %v1359_v25  ;;  %v1558_v30 = vld [vmem:[#allocation4 + $0xcc] sm:$0xf]  ;;  %v1366_v31 = vor.u32 %v1560_v29, %v1365_v28  ;;  %v1367_v32 = vld [vmem:[#allocation4 + $0xd8] sm:$0xf0]  ;;  %v1341_v33 = vld [vmem:[#allocation4 + $0xa0] sm:$0xf]  ;;  %v83_v24 = vlaneseq }
  0x16   :  { %158 = vmatpush.bf16.msra.mxu0 %v1530_v4  ;;  %v1555_v34 = vld [vmem:[#allocation4 + $0xac] sm:$0xf0]  ;;  %v1370_v35 = vor.u32 %v1558_v30, %v1367_v32  ;;  %v1553_v36 = vld [vmem:[#allocation4 + $0xa4] sm:$0xf]  ;;  %v1343_v37 = vld [vmem:[#allocation4 + $0xb0] sm:$0xf0] }
  0x17   :  { %v1349_v38 = vld [vmem:[#allocation4 + $0xa8] sm:$0xf]  ;;  %v1342_v39 = vor.u32 %v1555_v34, %v1341_v33  ;;  %v1556_v40 = vld [vmem:[#allocation4 + $0xb4] sm:$0xf0]  ;;  %v1554_v41 = vld [vmem:[#allocation4 + $0xac] sm:$0xf]  ;;  %v1346_v43 = vor.u32 %v1553_v36, %v1343_v37 }
  0x18   :  { %363 = vmatpush.bf16.msra.mxu1 %v1358_v26  ;;  %v1351_v42 = vld [vmem:[#allocation4 + $0xb8] sm:$0xf0]  ;;  %376 = vmatpush.bf16.msra.mxu2 %v1362_v27  ;;  %v1350_v44 = vor.u32 %v1556_v40, %v1349_v38  ;;  %v1325_v45 = vld [vmem:[#allocation4 + $0x80] sm:$0xf]  ;;  %v1551_v46 = vld [vmem:[#allocation4 + $0x8c] sm:$0xf0] }
  0x19   :  { %389 = vmatpush.bf16.msra.mxu3 %v1366_v31  ;;  %v1549_v47 = vld [vmem:[#allocation4 + $0x84] sm:$0xf]  ;;  %v1354_v48 = vor.u32 %v1554_v41, %v1351_v42  ;;  %v1327_v49 = vld [vmem:[#allocation4 + $0x90] sm:$0xf0]  ;;  %v1333_v50 = vld [vmem:[#allocation4 + $0x88] sm:$0xf]  ;;  %v1326_v54 = vor.u32 %v1551_v46, %v1325_v45 }
  0x1a   :  { %159 = vmatpush.bf16.msra.mxu0 %v1529_v5  ;;  %v1552_v51 = vld [vmem:[#allocation4 + $0x94] sm:$0xf0]  ;;  %v1550_v52 = vld [vmem:[#allocation4 + $0x8c] sm:$0xf]  ;;  %v1335_v53 = vld [vmem:[#allocation4 + $0x98] sm:$0xf0]  ;;  %v1330_v55 = vor.u32 %v1549_v47, %v1327_v49 }
  0x1b   :  { %v1334_v56 = vor.u32 %v1552_v51, %v1333_v50  ;;  %v1309_v57 = vld [vmem:[#allocation4 + $0x60] sm:$0xf]  ;;  %v1547_v58 = vld [vmem:[#allocation4 + $0x6c] sm:$0xf0]  ;;  %v1545_v59 = vld [vmem:[#allocation4 + $0x64] sm:$0xf]  ;;  %v1338_v60 = vor.u32 %v1550_v52, %v1335_v53 }
  0x1c   :  { %364 = vmatpush.bf16.msra.mxu1 %v1342_v39  ;;  %377 = vmatpush.bf16.msra.mxu2 %v1346_v43  ;;  %v1311_v61 = vld [vmem:[#allocation4 + $0x70] sm:$0xf0]  ;;  %v1317_v62 = vld [vmem:[#allocation4 + $0x68] sm:$0xf]  ;;  %v1548_v63 = vld [vmem:[#allocation4 + $0x74] sm:$0xf0]  ;;  %v1310_v2 = vor.u32 %v1547_v58, %v1309_v57 }
  0x1d   :  { %390 = vmatpush.bf16.msra.mxu3 %v1350_v44  ;;  %v1546_v0 = vld [vmem:[#allocation4 + $0x6c] sm:$0xf]  ;;  %v1319_v1 = vld [vmem:[#allocation4 + $0x78] sm:$0xf0]  ;;  %v1314_v3 = vor.u32 %v1545_v59, %v1311_v61  ;;  %v1318_v4 = vor.u32 %v1548_v63, %v1317_v62  ;;  %v1293_v5 = vld [vmem:[#allocation4 + $0x40] sm:$0xf] }
  0x1e   :  { %160 = vmatpush.bf16.msra.mxu0 %v1528_v6  ;;  %v1543_v6 = vld [vmem:[#allocation4 + $0x4c] sm:$0xf0]  ;;  %v1301_v10 = vld [vmem:[#allocation4 + $0x48] sm:$0xf]  ;;  %v1544_v11 = vld [vmem:[#allocation4 + $0x54] sm:$0xf0] }
  0x1f   :  { %v1542_v12 = vld [vmem:[#allocation4 + $0x4c] sm:$0xf]  ;;  %v1303_v13 = vld [vmem:[#allocation4 + $0x58] sm:$0xf0]  ;;  %v1294_v14 = vor.u32 %v1543_v6, %v1293_v5  ;;  %v1302_v16 = vor.u32 %v1544_v11, %v1301_v10  ;;  %v1277_v17 = vld [vmem:[#allocation4 + $0x20] sm:$0xf] }
  0x20   :  { %365 = vmatpush.bf16.msra.mxu1 %v1326_v54  ;;  %378 = vmatpush.bf16.msra.mxu2 %v1330_v55  ;;  %v1539_v18 = vld [vmem:[#allocation4 + $0x2c] sm:$0xf0]  ;;  %v1537_v19 = vld [vmem:[#allocation4 + $0x24] sm:$0xf]  ;;  %v1306_v20 = vor.u32 %v1542_v12, %v1303_v13  ;;  %v1279_v21 = vld [vmem:[#allocation4 + $0x30] sm:$0xf0]  ;;  %v513_v13 = vstv %s2111_s0 }
  0x21   :  { %391 = vmatpush.bf16.msra.mxu3 %v1334_v56  ;;  %v1540_v23 = vld [vmem:[#allocation4 + $0x34] sm:$0xf0]  ;;  %v1538_v25 = vld [vmem:[#allocation4 + $0x2c] sm:$0xf]  ;;  %v1287_v26 = vld [vmem:[#allocation4 + $0x38] sm:$0xf0]  ;;  %v1278_v27 = vor.u32 %v1539_v18, %v1277_v17  ;;  %v1282_v28 = vor.u32 %v1537_v19, %v1279_v21 }
  0x22   :  { %161 = vmatpush.bf16.msra.mxu0 %v1527_v7  ;;  %v1541_v7 = vld [vmem:[#allocation4 + $0x44] sm:$0xf]  ;;  %v1290_v30 = vor.u32 %v1538_v25, %v1287_v26  ;;  %v1910_v31 = vand.u32 127, %v83_v24  ;;  %v1789_v33 = vmov 1.0|1.0   ;;  %v1566_v47 = vld [vmem:[%s2115_s4 + $0x8] sm:$0xff] }
  0x23   :  { %v1261_v34 = vld [vmem:[#allocation4] sm:$0xf]  ;;  %v1533_v36 = vld [vmem:[#allocation4 + $0x4] sm:$0xf]  ;;  %v1263_v38 = vld [vmem:[#allocation4 + $0x10] sm:$0xf0] }
  0x24   :  { %366 = vmatpush.bf16.msra.mxu1 %v1310_v2  ;;  %379 = vmatpush.bf16.msra.mxu2 %v1314_v3  ;;  %v1269_v39 = vld [vmem:[#allocation4 + $0x8] sm:$0xf]  ;;  %v1536_v40 = vld [vmem:[#allocation4 + $0x14] sm:$0xf0]  ;;  %v1266_v41 = vor.u32 %v1533_v36, %v1263_v38  ;;  %v1534_v43 = vld [vmem:[#allocation4 + $0xc] sm:$0xf]  ;;  %vm1943_vm5 = vcmp.lt.s32.totalorder %v1910_v31, %v513_v13 }
  0x25   :  { %392 = vmatpush.bf16.msra.mxu3 %v1318_v4  ;;  %v1270_v42 = vor.u32 %v1536_v40, %v1269_v39  ;;  %v1271_v44 = vld [vmem:[#allocation4 + $0x18] sm:$0xf0]  ;;  %v1565_v46 = vld [vmem:[%s2115_s4] sm:$0xff]  ;;  %v1578_v38 = vld [vmem:[%s2117_s6 + $0x28] sm:$0xff]  ;;  %vm824_vm10 = vcmask 130048   ;;  %vm850_vm11 = vcmask 1042434  }
  0x26   :  { %162 = vmatpush.bf16.msra.mxu0 %v1526_v8  ;;  %v1322_v8 = vor.u32 %v1546_v0, %v1319_v1  ;;  %v1274_v45 = vor.u32 %v1534_v43, %v1271_v44  ;;  %v1568_v52 = vld [vmem:[%s2115_s4 + $0x18] sm:$0xff]  ;;  %v1577_v39 = vld [vmem:[%s2117_s6 + $0x20] sm:$0xff]  ;;  %v1575_v43 = vld [vmem:[%s2117_s6 + $0x10] sm:$0xff]  ;;  %vm853_vm12 = vcmask 1043459   ;;  %vm1031_vm13 = vcmp.eq.s32.totalorder %v1910_v31, 1  ;;  %s1040_s25 = sadd.f32 2.0, %s1039_s1 }
  0x27   :  { %v1580_v36 = vld [vmem:[%s2117_s6 + $0x38] sm:$0xff]  ;;  %vm1033_vm14 = vcmp.eq.s32.totalorder %v1910_v31, 3  ;;  %s1794_s27 = smov [#allocation10]   ;;  %s1204_s16 = sshll.u32 %s2126_s15, 4  ;;  %s1205_s16 = int_to_ptr.hbm [resolvable:$true] %s1204_s16 }
  0x28   :  { %367 = vmatpush.bf16.msra.mxu1 %v1294_v14  ;;  %v1576_v40 = vld [vmem:[%s2117_s6 + $0x18] sm:$0xff]  ;;  %s1191_s28 = sshll.u32 %s1794_s27, 4  ;;  %s1795_s3 = smov [#allocation12]   ;;  %s1192_s28 = int_to_ptr.vmem [resolvable:$true] %s1191_s28 }
  0x29   :  { %393 = vmatpush.bf16.msra.mxu3 %v1302_v16  ;;  %s1202_s9 = sshll.u32 %s1795_s3, 4  ;;  %s1182_s18 = sshll.u32 %s2124_s13, 4  ;;  %s1203_s9 = int_to_ptr.vmem [resolvable:$true] %s1202_s9  ;;  %s1183_s18 = int_to_ptr.hbm [resolvable:$true] %s1182_s18 }
  0x2a   :  { %163 = vmatpush.bf16.msra.mxu0 %v1525_v9  ;;  %v1295_v9 = vld [vmem:[#allocation4 + $0x50] sm:$0xf0] }
  0x2b   :  { %v1298_v15 = vor.u32 %v1541_v7, %v1295_v9  ;;  %v1790_v9 = vmov 65535  }
  0x2c   :  { %368 = vmatpush.bf16.msra.mxu1 %v1278_v27  ;;  %v629_v10 = vsel %vm627_vm3, 4294967295, %v1790_v9 }
  0x2d   :  { %380 = vmatpush.bf16.msra.mxu2 %v1298_v15  ;;  %v630_v11 = vsel %vm628_vm4, %v629_v10, 0 }
  0x2e   :  { %401 = vmatpush.bf16.msrb.mxu0 %v1386_v22  ;;  %v1285_v22 = vld [vmem:[#allocation4 + $0x28] sm:$0xf] }
  0x2f   :  { %v1286_v29 = vor.u32 %v1540_v23, %v1285_v22 }
  0x31   :  { %381 = vmatpush.bf16.msra.mxu2 %v1282_v28  ;;  %394 = vmatpush.bf16.msra.mxu3 %v1286_v29 }
  0x32   :  { %402 = vmatpush.bf16.msrb.mxu0 %v1370_v35  ;;  %v1535_v35 = vld [vmem:[#allocation4 + $0xc] sm:$0xf0] }
  0x33   :  { %v1262_v37 = vor.u32 %v1535_v35, %v1261_v34 }
  0x35   :  { %369 = vmatpush.bf16.msra.mxu1 %v1262_v37  ;;  %382 = vmatpush.bf16.msra.mxu2 %v1266_v41  ;;  %v1579_v37 = vld [vmem:[%s2117_s6 + $0x30] sm:$0xff]  ;;  %v1570_v41 = vld [vmem:[%s2116_s5 + $0x8] sm:$0xff] }
  0x36   :  { %403 = vmatpush.bf16.msrb.mxu0 %v1354_v48  ;;  %395 = vmatpush.bf16.msra.mxu3 %v1270_v42  ;;  %v1567_v48 = vld [vmem:[%s2115_s4 + $0x10] sm:$0xff]  ;;  %v656_v42 = vand.u32 %v1570_v41, %v630_v11 }
  0x39   :  { %446 = vmatpush.bf16.xpose.msrb.mxu1 %v1565_v46  ;;  %465 = vmatpush.bf16.xpose.msrb.mxu2 %v1566_v47  ;;  %v1572_v47 = vld [vmem:[%s2116_s5 + $0x18] sm:$0xff] }
  0x3a   :  { %404 = vmatpush.bf16.msrb.mxu0 %v1338_v60  ;;  %484 = vmatpush.bf16.xpose.msrb.mxu3 %v1567_v48  ;;  %v704_v48 = vand.u32 %v1572_v47, %v630_v11 }
  0x3e   :  { %405 = vmatpush.bf16.msrb.mxu0 %v1322_v8  ;;  %v1569_v8 = vld [vmem:[%s2116_s5] sm:$0xff] }
  0x3f   :  { %v632_v12 = vand.u32 %v1569_v8, %v630_v11 }
  0x42   :  { %406 = vmatpush.bf16.msrb.mxu0 %v1306_v20 }
  0x46   :  { %407 = vmatpush.bf16.msrb.mxu0 %v1290_v30 }
  0x4a   :  { %408 = vmatpush.bf16.msrb.mxu0 %v1274_v45  ;;  %v1574_v45 = vld [vmem:[%s2117_s6 + $0x8] sm:$0xff] }
  0x81   :  { %v87_v32 = vpop.permute.xlu0 %86 }
  0x82   :  { %vm88_vm0 = vcmp.eq.s32.totalorder %v1910_v31, %v87_v32 }
  0x83   :  { %vm1257_vm1 = vmpackc.low %vm88_vm0, %vm88_vm0 }
  0x84   :  { %1258 = vmatmul.msk.bf16.vlgmr.msra.gmra.mxu0 %vm1257_vm1, %v1789_v33 }
 0x101   :  { %v1922_v49 = vpop.f32.mrf.mxu0 }
 0x102   :  { %v169_v50 = vpack.c.bf16 %v1922_v49, %v1922_v49 }
 0x104   :  { %370 = vmatmul.bf16.vlgmr.msra.gmra.mxu1 %v169_v50  ;;  %383 = vmatmul.bf16.vlgmr.msra.gmra.mxu2 %v169_v50 }
 0x105   :  { %396 = vmatmul.bf16.vlgmr.msra.gmra.mxu3 %v169_v50  ;;  %409 = vmatmul.bf16.vlgmr.msrb.gmra.mxu0 %v169_v50  ;;  %v1573_v50 = vld [vmem:[%s2117_s6] sm:$0xff]  ;;  %s1791_s6 = smov 1  }
 0x106   :  { %503 = vmatpush.bf16.xpose.msra.mxu1 %v1568_v52  ;;  %641 = vmatpush.bf16.msra.mxu2 %v632_v12 }
 0x107   :  { %665 = vmatpush.bf16.msra.mxu3 %v656_v42 }
 0x109   :  { %v167_v51 = vpop.f32.mrf.mxu0 }
 0x181   :  { %v371_v53 = vpop.f32.mrf.mxu1 }
 0x182   :  { %v1929_v54 = vpop.f32.mrf.mxu0  ;;  %v421_v55 = vpack.c.bf16 %v371_v53, %v371_v53  ;;  %v415_v56 = vrot.slane %v371_v53, 1  ;;  %v416_v57 = vrot.slane %v371_v53, 2  ;;  %v417_v4 = vrot.slane %v371_v53, 3 }
 0x184   :  { %447 = vmatmul.bf16.vlgmr.msrb.gmra.mxu1 %v421_v55  ;;  %v422_v58 = vpack.c.bf16 %v415_v56, %v415_v56  ;;  %v423_v59 = vpack.c.bf16 %v416_v57, %v416_v57  ;;  %v424_v7 = vpack.c.bf16 %v417_v4, %v417_v4  ;;  %v1571_v55 = vld [vmem:[%s2116_s5 + $0x10] sm:$0xff] }
 0x185   :  { %713 = vmatpush.bf16.msrb.mxu1 %v704_v48 }
 0x186   :  { %466 = vmatmul.bf16.vlgmr.msrb.gmra.mxu2 %v422_v58  ;;  %485 = vmatmul.bf16.vlgmr.msrb.gmra.mxu3 %v423_v59  ;;  %v680_v58 = vand.u32 %v1571_v55, %v630_v11 }
 0x187   :  { %v384_v60 = vpop.f32.mrf.mxu2  ;;  %788 = vmatpush.bf16.msrb.mxu2 %v1580_v36 }
 0x188   :  { %v519_v61 = vmul.f32 %v384_v60, %v371_v53  ;;  %v1171_v62 = vpack.c.bf16 %v384_v60, %v384_v60  ;;  %v1931_v63 = vpop.f32.mrf.mxu3  ;;  %689 = vmatpush.bf16.msrb.mxu3 %v680_v58 }
 0x189   :  { %v373_v0 = vpop.f32.mrf.mxu1  ;;  %v1173_v1 = vpack.c.bf16 %v1931_v63, %v1931_v63 }
 0x18a   :  { %1172 = vst [vmem:[#allocation10] sm:$0x3] %v1171_v62  ;;  %v412_v2 = vpop.f32.mrf.mxu0  ;;  %v521_v3 = vsel %vm520_vm2, %v519_v61, 0.0 }
 0x18b   :  { %522 = vadd.xlane.f32.xlu0 %v521_v3  ;;  %1174 = vst [vmem:[#allocation12] sm:$0x3] %v1173_v1  ;;  %789 = vmatpush.bf16.msrb.mxu2 %v1579_v37 }
 0x18f   :  { %v386_v5 = vpop.f32.mrf.mxu2  ;;  %790 = vmatpush.bf16.msrb.mxu2 %v1578_v38  ;;  %v608_v38 = vrot.slane %v1931_v63, 1 }
 0x190   :  { %v399_v6 = vpop.f32.mrf.mxu3 }
 0x193   :  { %791 = vmatpush.bf16.msrb.mxu2 %v1577_v39  ;;  %v1581_v39 = vld [vmem:[%s2118_s7] sm:$0xff] }
 0x194   :  { %504 = vmatmul.bf16.vlgmr.msra.gmra.mxu1 %v424_v7 }
 0x197   :  { %792 = vmatpush.bf16.msrb.mxu2 %v1576_v40 }
 0x19b   :  { %793 = vmatpush.bf16.msrb.mxu2 %v1575_v43 }
 0x19f   :  { %794 = vmatpush.bf16.msrb.mxu2 %v1574_v45  ;;  %v610_v45 = vrot.slane %v1931_v63, 3 }
 0x1a3   :  { %795 = vmatpush.bf16.msrb.mxu2 %v1573_v50 }
 0x1fe   :  { %v523_v44 = vpop.xlane.xlu0 %522 }
 0x1ff   :  { %v524_v46 = vmul.f32 0.088388346, %v523_v44 }
 0x201   :  { %v448_v14 = vpop.f32.mrf.mxu1  ;;  %v526_v51 = vperm.slane %v524_v46, 0  ;;  %v527_v60 = vperm.slane %v524_v46, 1  ;;  %v528_v61 = vperm.slane %v524_v46, 2  ;;  %v529_v9 = vperm.slane %v524_v46, 3 }
 0x202   :  { %v509_v16 = vmul.f32 0.088388346, %v448_v14 }
 0x204   :  { %v515_v17 = vsel %vm1943_vm5, %v509_v16, -inf }
 0x205   :  { %v535_v18 = vsel %vm534_vm6, %v515_v17, -inf }
 0x206   :  { %536 = vmax.xlane.f32.xlu1 %v535_v18 }
 0x209   :  { %v450_v19 = vpop.f32.mrf.mxu1  ;;  %v467_v20 = vpop.f32.mrf.mxu2 }
 0x20a   :  { %v510_v21 = vmul.f32 0.088388346, %v467_v20  ;;  %v486_v22 = vpop.f32.mrf.mxu3 }
 0x20b   :  { %v511_v23 = vmul.f32 0.088388346, %v486_v22 }
 0x20c   :  { %v516_v24 = vsel %vm1943_vm5, %v510_v21, -inf  ;;  %v723_v21 = vpack.c.bf16 %v1929_v54, %v1929_v54 }
 0x20d   :  { %v1954_v25 = vsel %vm1943_vm5, %v511_v23, -inf  ;;  %v538_v26 = vsel %vm534_vm6, %v516_v24, -inf }
 0x20e   :  { %v541_v27 = vsel %vm534_vm6, %v1954_v25, -inf  ;;  %539 = vmax.xlane.f32.xlu1 %v538_v26 }
 0x20f   :  { %542 = vmax.xlane.f32.xlu2 %v541_v27 }
 0x211   :  { %v469_v28 = vpop.f32.mrf.mxu2  ;;  %v505_v29 = vpop.f32.mrf.mxu1 }
 0x212   :  { %v488_v30 = vpop.f32.mrf.mxu3  ;;  %v512_v32 = vmul.f32 0.088388346, %v505_v29 }
 0x214   :  { %v518_v33 = vsel %vm1943_vm5, %v512_v32, -inf }
 0x215   :  { %v544_v34 = vsel %vm534_vm6, %v518_v33, -inf }
 0x217   :  { %545 = vmax.xlane.f32.xlu2 %v544_v34 }
 0x219   :  { %v507_v35 = vpop.f32.mrf.mxu1 }
 0x279   :  { %v537_v52 = vpop.xlane.xlu1 %536 }
 0x27a   :  { %v547_v53 = vmax.f32 %v537_v52, %v526_v51 }
 0x27c   :  { %v551_v56 = vsub.f32 %v515_v17, %v547_v53  ;;  %v563_v57 = vsub.f32 %v526_v51, %v547_v53 }
 0x27e   :  { %v555_v59 = vmul.f32 1.442695, %v551_v56  ;;  %v567_v26 = vmul.f32 1.442695, %v563_v57 }
 0x280   :  { %1618 = vpow2.f32 %v555_v59 }
 0x281   :  { %v540_v62 = vpop.xlane.xlu1 %539 }
 0x282   :  { %v543_v0 = vpop.xlane.xlu2 %542  ;;  %v548_v1 = vmax.f32 %v540_v62, %v527_v60 }
 0x283   :  { %v549_v2 = vmax.f32 %v543_v0, %v528_v61 }
 0x284   :  { %v552_v3 = vsub.f32 %v516_v24, %v548_v1  ;;  %v564_v4 = vsub.f32 %v527_v60, %v548_v1  ;;  %v802_v60 = vld [vmem:[%s2119_s8] sm:$0xf]  ;;  %s1193_s8 = sshll.u32 %s2125_s14, 4  ;;  %s1796_s14 = smov [#allocation9]   ;;  %s1194_s8 = int_to_ptr.hbm [resolvable:$true] %s1193_s8 }
 0x285   :  { %v565_v5 = vsub.f32 %v528_v61, %v549_v2  ;;  %v553_v15 = vsub.f32 %v1954_v25, %v549_v2  ;;  %1196 = dma.vmem_to_hbm [thread:$0]  %s1192_s28, 32, %s1194_s8, [#allocation11]  }
 0x286   :  { %v1619_v6 = vpop.eup %1618  ;;  %v557_v7 = vmul.f32 1.442695, %v552_v3  ;;  %v569_v27 = vmul.f32 1.442695, %v564_v4  ;;  %v609_v3 = vrot.slane %v1931_v63, 2  ;;  %s1180_s15 = sshll.u32 %s1796_s14, 4  ;;  %s1181_s15 = int_to_ptr.vmem [resolvable:$true] %s1180_s15 }
 0x287   :  { %v595_v8 = vpack.c.bf16 %v1619_v6, %v1619_v6  ;;  %v559_v19 = vmul.f32 1.442695, %v553_v15  ;;  %v575_v22 = vsel %vm534_vm6, %v1619_v6, 0.0  ;;  %v571_v50 = vmul.f32 1.442695, %v565_v5 }
 0x288   :  { %1620 = vpow2.f32 %v557_v7  ;;  %1207 = dma.vmem_to_hbm [thread:$0]  %s1203_s9, 32, %s1205_s16, [#allocation11]  }
 0x289   :  { %1407 = vmatmul.msk.bf16.vlgmr.msra.gmra.mxu2 %vm623_vm7, %v595_v8 }
 0x28a   :  { %v546_v10 = vpop.xlane.xlu2 %545 }
 0x28b   :  { %v550_v11 = vmax.f32 %v546_v10, %v529_v9 }
 0x28d   :  { %v554_v12 = vsub.f32 %v518_v33, %v550_v11  ;;  %v566_v13 = vsub.f32 %v529_v9, %v550_v11  ;;  %v1589_v11 = vld [vmem:[%s2121_s10 + $0x38] sm:$0xff] }
 0x28e   :  { %v1621_v14 = vpop.eup %1620  ;;  %923 = vmatpush.bf16.msra.mxu0 %v1589_v11 }
 0x28f   :  { %v596_v16 = vpack.c.bf16 %v1621_v14, %v1621_v14  ;;  %v561_v17 = vmul.f32 1.442695, %v554_v12  ;;  %v578_v18 = vsel %vm534_vm6, %v1621_v14, 0.0  ;;  %v573_v54 = vmul.f32 1.442695, %v566_v13 }
 0x290   :  { %579 = vadd.xlane.f32.xlu2 %v578_v18 }
 0x291   :  { %1622 = vpow2.f32 %v561_v17  ;;  %1412 = vmatmul.msk.bf16.vlgmr.msra.gmra.mxu3 %vm623_vm7, %v596_v16 }
 0x292   :  { %1624 = vpow2.f32 %v559_v19  ;;  %835 = vmatpush.bf16.msra.mxu3 %v1581_v39  ;;  %v1594_v39 = vld [vmem:[#allocation7 + $0x20] sm:$0xff] }
 0x293   :  { %1626 = vpow2.f32 %v567_v26 }
 0x294   :  { %1628 = vpow2.f32 %v569_v27 }
 0x295   :  { %1630 = vpow2.f32 %v573_v54  ;;  %v1587_v54 = vld [vmem:[%s2121_s10 + $0x28] sm:$0xff] }
 0x297   :  { %v1999_v20 = vpop.eup %1622 }
 0x298   :  { %v598_v23 = vpack.c.bf16 %v1999_v20, %v1999_v20  ;;  %576 = vadd.xlane.f32.xlu2 %v575_v22  ;;  %v1625_v24 = vpop.eup %1624  ;;  %v584_v10 = vsel %vm534_vm6, %v1999_v20, 0.0 }
 0x299   :  { %796 = vmatmul.bf16.vlgmr.msrb.gmra.mxu2 %v723_v21  ;;  %v597_v25 = vpack.c.bf16 %v1625_v24, %v1625_v24  ;;  %v1627_v29 = vpop.eup %1626  ;;  %v581_v8 = vsel %vm534_vm6, %v1625_v24, 0.0 }
 0x29a   :  { %1422 = vmatmul.msk.bf16.vlgmr.msrb.gmra.mxu1 %vm623_vm7, %v598_v23  ;;  %v1629_v30 = vpop.eup %1628  ;;  %v614_v33 = vmul.f32 %v1627_v29, %v1931_v63  ;;  %v1588_v63 = vld [vmem:[%s2121_s10 + $0x30] sm:$0xff] }
 0x29b   :  { %v1631_v40 = vpop.eup %1630  ;;  %v615_v41 = vmul.f32 %v1629_v30, %v608_v38  ;;  %924 = vmatpush.bf16.msra.mxu0 %v1588_v63  ;;  %v1595_v38 = vld [vmem:[#allocation7 + $0x28] sm:$0xff] }
 0x29c   :  { %v617_v51 = vmul.f32 %v1631_v40, %v610_v45 }
 0x29f   :  { %925 = vmatpush.bf16.msra.mxu0 %v1587_v54 }
 0x2a1   :  { %1417 = vmatmul.msk.bf16.vlgmr.msrb.gmra.mxu3 %vm623_vm7, %v597_v25 }
 0x303   :  { %v580_v28 = vpop.xlane.xlu2 %579 }
 0x304   :  { %v588_v34 = vadd.f32 %v1629_v30, %v580_v28  ;;  %v1586_v30 = vld [vmem:[%s2121_s10 + $0x20] sm:$0xff] }
 0x305   :  { %926 = vmatpush.bf16.msra.mxu0 %v1586_v30 }
 0x30b   :  { %v577_v32 = vpop.xlane.xlu2 %576 }
 0x30c   :  { %v587_v35 = vadd.f32 %v1627_v29, %v577_v32  ;;  %v643_v36 = vpop.f32.mrf.mxu2  ;;  %v1585_v32 = vld [vmem:[%s2121_s10 + $0x18] sm:$0xff] }
 0x30d   :  { %v644_v37 = vadd.f32 %v643_v36, %v614_v33  ;;  %927 = vmatpush.bf16.msra.mxu0 %v1585_v32  ;;  %v1584_v33 = vld [vmem:[%s2121_s10 + $0x10] sm:$0xff]  ;;  %v1597_v36 = vld [vmem:[#allocation7 + $0x38] sm:$0xff] }
 0x30e   :  { %1632 = vrcp.f32 %v587_v35  ;;  %v1582_v35 = vld [vmem:[%s2121_s10] sm:$0xff]  ;;  %1006 = vmatpush.bf16.msra.mxu1 %v1597_v36 }
 0x30f   :  { %1634 = vrcp.f32 %v588_v34  ;;  %v1583_v34 = vld [vmem:[%s2121_s10 + $0x8] sm:$0xff] }
 0x310   :  { %1636 = vpow2.f32 %v571_v50 }
 0x311   :  { %928 = vmatpush.bf16.msra.mxu0 %v1584_v33 }
 0x314   :  { %v1633_v42 = vpop.eup %1632  ;;  %v645_v43 = vpop.f32.mrf.mxu2 }
 0x315   :  { %v667_v44 = vpop.f32.mrf.mxu3  ;;  %v719_v46 = vmul.f32 %v1633_v42, %v644_v37  ;;  %v1635_v48 = vpop.eup %1634  ;;  %929 = vmatpush.bf16.msra.mxu0 %v1583_v34  ;;  %v1596_v37 = vld [vmem:[#allocation7 + $0x30] sm:$0xff] }
 0x316   :  { %v668_v47 = vadd.f32 %v667_v44, %v615_v41  ;;  %v1637_v1 = vpop.eup %1636  ;;  %1007 = vmatpush.bf16.msra.mxu1 %v1596_v37  ;;  %v1592_v42 = vld [vmem:[#allocation7 + $0x10] sm:$0xff] }
 0x317   :  { %v715_v53 = vpop.f32.mrf.mxu1  ;;  %v616_v4 = vmul.f32 %v1637_v1, %v609_v3 }
 0x318   :  { %v720_v52 = vmul.f32 %v1635_v48, %v668_v47  ;;  %v716_v55 = vadd.f32 %v715_v53, %v617_v51  ;;  %v1591_v51 = vld [vmem:[#allocation7 + $0x8] sm:$0xff] }
 0x319   :  { %930 = vmatpush.bf16.msra.mxu0 %v1582_v35 }
 0x31a   :  { %v846_v56 = vrot.slane %v720_v52, 7  ;;  %1008 = vmatpush.bf16.msra.mxu1 %v1595_v38  ;;  %v1590_v52 = vld [vmem:[#allocation7] sm:$0xff] }
 0x31c   :  { %v848_v57 = vsel %vm847_vm8, %v846_v56, %v719_v46  ;;  %v797_v59 = vpop.f32.mrf.mxu2 }
 0x31d   :  { %v669_v58 = vpop.f32.mrf.mxu3  ;;  %v801_v61 = vmul.f32 0.088388346, %v797_v59 }
 0x31e   :  { %1009 = vmatpush.bf16.msra.mxu1 %v1594_v39  ;;  %v1617_v58 = vld [vmem:[%s2123_s12] ss:$0 sm:$0xff] }
 0x31f   :  { %v717_v62 = vpop.f32.mrf.mxu1  ;;  %v803_v0 = vadd.f32 %v802_v60, %v801_v61 }
 0x321   :  { %v805_v2 = vsel %vm804_vm9, %v803_v0, -inf }
 0x322   :  { %806 = vmax.xlane.f32.xlu1 %v805_v2 }
 0x324   :  { %v799_v6 = vpop.f32.mrf.mxu2 }
 0x325   :  { %v691_v5 = vpop.f32.mrf.mxu3 }
 0x326   :  { %v692_v7 = vadd.f32 %v691_v5, %v616_v4 }
 0x32a   :  { %582 = vadd.xlane.f32.xlu1 %v581_v8 }
 0x32d   :  { %v693_v9 = vpop.f32.mrf.mxu3 }
 0x332   :  { %585 = vadd.xlane.f32.xlu1 %v584_v10 }
 0x395   :  { %v807_v12 = vpop.xlane.xlu1 %806 }
 0x396   :  { %v808_v13 = vsub.f32 %v803_v0, %v807_v12 }
 0x398   :  { %v809_v14 = vmul.f32 1.442695, %v808_v13 }
 0x39a   :  { %1638 = vpow2.f32 %v809_v14 }
 0x39d   :  { %v583_v15 = vpop.xlane.xlu1 %582 }
 0x39e   :  { %v589_v16 = vadd.f32 %v1637_v1, %v583_v15 }
 0x3a0   :  { %v1639_v17 = vpop.eup %1638  ;;  %1640 = vrcp.f32 %v589_v16  ;;  %v1069_v16 = vstv %s1040_s25 }
 0x3a1   :  { %v815_v18 = vpack.c.bf16 %v1639_v17, %v1639_v17  ;;  %v811_v19 = vsel %vm804_vm9, %v1639_v17, 0.0  ;;  %vm1075_vm1 = vweird.f32 %v1069_v16  ;;  %vm1094_vm9 = vcmp.eq.s32.totalorder %v1910_v31, 0 }
 0x3a2   :  { %812 = vadd.xlane.f32.xlu2 %v811_v19 }
 0x3a3   :  { %1459 = vmatmul.msk.bf16.vlgmr.msra.gmra.mxu3 %vm824_vm10, %v815_v18  ;;  %vm1101_vm10 = vcmp.eq.s32.totalorder %v1910_v31, 2 }
 0x3a5   :  { %v586_v20 = vpop.xlane.xlu1 %585 }
 0x3a6   :  { %v1641_v21 = vpop.eup %1640  ;;  %v590_v22 = vadd.f32 %v1631_v40, %v586_v20  ;;  %v1593_v40 = vld [vmem:[#allocation7 + $0x18] sm:$0xff] }
 0x3a7   :  { %v721_v23 = vmul.f32 %v1641_v21, %v692_v7  ;;  %1010 = vmatpush.bf16.msra.mxu1 %v1593_v40 }
 0x3a8   :  { %1642 = vrcp.f32 %v590_v22 }
 0x3a9   :  { %v849_v24 = vrot.slane %v721_v23, 6 }
 0x3ab   :  { %v851_v25 = vsel %vm850_vm11, %v849_v24, %v848_v57  ;;  %1011 = vmatpush.bf16.msra.mxu1 %v1592_v42  ;;  %vm1108_vm11 = vcmp.eq.s32.totalorder %v1910_v31, 4 }
 0x3ae   :  { %v1643_v26 = vpop.eup %1642 }
 0x3af   :  { %v722_v27 = vmul.f32 %v1643_v26, %v716_v55  ;;  %1012 = vmatpush.bf16.msra.mxu1 %v1591_v51 }
 0x3b1   :  { %v852_v28 = vrot.slane %v722_v27, 5  ;;  %v1079_v27 = vand.u32 2147483647, %v1069_v16 }
 0x3b3   :  { %v854_v29 = vsel %vm853_vm12, %v852_v28, %v851_v25  ;;  %1013 = vmatpush.bf16.msra.mxu1 %v1590_v52  ;;  %v1081_v25 = vand.u32 2147483648, %v1069_v16  ;;  %v2068_v28 = vld [vmem:[%s2113_s2] sm:$0xf]  ;;  %vm1080_vm5 = vcmp.eq.f32.partialorder %v1079_v27, 8.507059e+37  ;;  %s1793_s2 = smov 127   ;;  %vm1163_vm12 = vcmp.eq.s32.totalorder %v1910_v31, 5 }
 0x3b4   :  { %v856_v46 = vadd.f32 %v854_v29, %v1922_v49  ;;  %vm1037_vm8 = vcmp.gt.f32.partialorder %v2068_v28, 0.5 }
 0x3b5   :  { %v1082_v29 = vor.u32 1.1754944e-38, %v1081_v25 }
 0x415   :  { %v813_v41 = vpop.xlane.xlu2 %812 }
 0x416   :  { %1644 = vrcp.f32 %v813_v41  ;;  %v1792_v41 = vmov 1  }
 0x417   :  { %1614 = vset.pattern.permute.xlu1 %v1792_v41  ;;  %1616 = vset.pattern.permute.xlu2 %v1792_v41 }
 0x418   :  { %1615 = vset.pattern.permute.xlu0 %v1792_v41 }
 0x41c   :  { %v1645_v43 = vpop.eup %1644 }
 0x426   :  { %v837_v44 = vpop.f32.mrf.mxu3 }
 0x427   :  { %v841_v45 = vmul.f32 %v1645_v43, %v837_v44 }
 0x429   :  { %v857_v47 = vadd.f32 %v856_v46, %v841_v45 }
 0x42b   :  { %v858_v48 = vpack.c.bf16 %v857_v47, %v857_v47 }
 0x42d   :  { %931 = vmatmul.bf16.vlgmr.msra.gmra.mxu0 %v858_v48 }
 0x42e   :  { %v839_v50 = vpop.f32.mrf.mxu3 }
 0x42f   :  { %v1038_v50 = vand.u32 2147483647, %v2068_v28 }
 0x4aa   :  { %v932_v53 = vpop.f32.mrf.mxu0 }
 0x4ab   :  { %1646 = vtanh.f32 %v932_v53 }
 0x4b1   :  { %v1647_v55 = vpop.eup %1646 }
 0x4b2   :  { %v937_v56 = vpack.c.bf16 %v1647_v55, %v1647_v55  ;;  %v934_v57 = vpop.f32.mrf.mxu0 }
 0x4b4   :  { %1014 = vmatmul.bf16.vlgmr.msra.gmra.mxu1 %v937_v56 }
 0x531   :  { %v1015_v59 = vpop.f32.mrf.mxu1 }
 0x532   :  { %v1016_v49 = vadd.f32 %v1617_v58, %v1015_v59 }
 0x534   :  { %v1019_v60 = vsel %vm520_vm2, %v1016_v49, -inf }
 0x535   :  { %1020 = vmax.xlane.f32.xlu1 %v1019_v60 }
 0x539   :  { %v1017_v61 = vpop.f32.mrf.mxu1 }
 0x5a8   :  { %v1021_v62 = vpop.xlane.xlu1 %1020 }
 0x5a9   :  { %v1022_v0 = vsub.f32 %v1016_v49, %v1021_v62 }
 0x5ab   :  { %v1023_v1 = vmul.f32 1.442695, %v1022_v0 }
 0x5ad   :  { %1648 = vpow2.f32 %v1023_v1 }
 0x5b3   :  { %v1649_v2 = vpop.eup %1648 }
 0x5b4   :  { %v1025_v3 = vsel %vm520_vm2, %v1649_v2, 0.0 }
 0x5b5   :  { %1026 = vadd.xlane.f32.xlu2 %v1025_v3 }
 0x628   :  { %v1027_v4 = vpop.xlane.xlu2 %1026 }
 0x629   :  { %1650 = vlog2.f32 %v1027_v4 }
 0x62a   :  { %1652 = vrcp.f32 %v1069_v16 }
 0x62f   :  { %v1651_v5 = vpop.eup %1650 }
 0x630   :  { %v1029_v6 = vmul.f32 0.6931472, %v1651_v5  ;;  %v1653_v17 = vpop.eup %1652 }
 0x631   :  { %v1071_v19 = vmul.f32 %v1653_v17, %v1069_v16  ;;  %vm1076_vm3 = vweird.f32 %v1653_v17 }
 0x632   :  { %v1030_v7 = vsub.f32 %v1022_v0, %v1029_v6  ;;  %vm1077_vm4 = vmor %vm1075_vm1, %vm1076_vm3 }
 0x633   :  { %v1072_v23 = vsub.f32 1.0, %v1071_v19 }
 0x634   :  { %v1032_v8 = vsel %vm1031_vm13, -inf, %v1030_v7 }
 0x635   :  { %v1524_v9 = vadd.f32 -0.5, %v1032_v8  ;;  %v1073_v24 = vmul.f32 %v1653_v17, %v1072_v23 }
 0x637   :  { %v1035_v10 = vsel %vm1033_vm14, %v1524_v9, %v1032_v8  ;;  %v1074_v26 = vadd.f32 %v1653_v17, %v1073_v24 }
 0x638   :  { %v1041_v11 = vsel %vm520_vm2, %v1035_v10, -inf }
 0x639   :  { %1042 = vmax.xlane.f32.xlu1 %v1041_v11  ;;  %v1078_v54 = vsel %vm1077_vm4, %v1653_v17, %v1074_v26 }
 0x63a   :  { %v1083_v32 = vsel %vm1080_vm5, %v1082_v29, %v1078_v54 }
 0x6ac   :  { %v1043_v63 = vpop.xlane.xlu1 %1042 }
 0x6ad   :  { %vm1044_vm15 = vcmp.eq.f32.partialorder %v1035_v10, %v1043_v63  ;;  %v1061_v30 = vadd.f32 %v1043_v63, %v2068_v28 }
 0x6ae   :  { %v1045_v12 = vsel %vm1044_vm15, %v1910_v31, 128 }
 0x6af   :  { %v1046_v13 = vsel %vm520_vm2, %v1045_v12, 2147483647  ;;  %v1084_v33 = vmul.f32 %v1083_v32, %v1061_v30 }
 0x6b0   :  { %v1048_v14 = vshra.s32 %v1046_v13, 16  ;;  %v1047_v18 = vand.u32 65535, %v1046_v13 }
 0x6b2   :  { %v1050_v15 = vcvt.s32.f32 %v1048_v14  ;;  %v1049_v21 = vcvt.s32.f32 %v1047_v18 }
 0x6b4   :  { %1051 = vmin.xlane.f32.xlu2 %v1050_v15 }
 0x727   :  { %v1052_v20 = vpop.xlane.xlu2 %1051 }
 0x728   :  { %vm1053_vm0 = vcmp.eq.f32.partialorder %v1050_v15, %v1052_v20  ;;  %v1058_v34 = vcvt.f32.s32 %v1052_v20 }
 0x729   :  { %v1054_v22 = vsel %vm1053_vm0, %v1049_v21, inf }
 0x72a   :  { %1055 = vmin.xlane.f32.xlu0 %v1054_v22  ;;  %v1059_v36 = vshll.u32 %v1058_v34, 16 }
 0x73e   :  { %1090 = vrot.lane.b32.xlu0 %v1084_v33, %s1791_s6 }
 0x79d   :  { %v1056_v35 = vpop.xlane.xlu0 %1055 }
 0x79e   :  { %v1057_v37 = vcvt.f32.s32 %v1056_v35 }
 0x7a0   :  { %v1060_v38 = vadd.s32 %v1059_v36, %v1057_v37 }
 0x7a2   :  { %vm1115_vm6 = vcmp.eq.s32.totalorder %v1910_v31, %v1060_v38  ;;  %v1062_v60 = vsel %vm1037_vm8, 2, %v1060_v38 }
 0x7a3   :  { %v1116_v39 = vsel %vm1115_vm6, -inf, %v1035_v10  ;;  %v1063_v61 = vcvt.s32.f32 %v1062_v60 }
 0x7a4   :  { %v1117_v40 = vsel %vm520_vm2, %v1116_v39, -inf }
 0x7a5   :  { %1118 = vmax.xlane.f32.xlu1 %v1117_v40 }
 0x7b0   :  { %v1091_v58 = vpop.permute.xlu0 %1090 }
 0x7be   :  { %1065 = vrot.lane.b32.xlu1 %v1061_v30, %s1791_s6 }
 0x818   :  { %v1119_v42 = vpop.xlane.xlu1 %1118 }
 0x819   :  { %vm1120_vm7 = vcmp.eq.f32.partialorder %v1116_v39, %v1119_v42  ;;  %v1137_v51 = vadd.f32 %v1119_v42, %v2068_v28 }
 0x81a   :  { %v1121_v43 = vsel %vm1120_vm7, %v1910_v31, 128 }
 0x81b   :  { %v1122_v44 = vsel %vm520_vm2, %v1121_v43, 2147483647  ;;  %v1145_v52 = vmul.f32 %v1137_v51, %v1083_v32 }
 0x81c   :  { %v1124_v45 = vshra.s32 %v1122_v44, 16  ;;  %v1123_v53 = vand.u32 65535, %v1122_v44 }
 0x81e   :  { %v1126_v46 = vcvt.s32.f32 %v1124_v45  ;;  %v1125_v56 = vcvt.s32.f32 %v1123_v53 }
 0x820   :  { %1127 = vmin.xlane.f32.xlu2 %v1126_v46 }
 0x830   :  { %v1066_v47 = vpop.permute.xlu1 %1065 }
 0x831   :  { %v1068_v48 = vsel %vm1037_vm8, -inf, %v1066_v47 }
 0x832   :  { %1097 = vperm.xlu1 %1614, %v1068_v48  }
 0x838   :  { %1086 = vrot.lane.b32.xlu2 %v1038_v50, %s1793_s2 }
 0x840   :  { %1147 = vrot.lane.b32.xlu2 %v1145_v52, %s1791_s6 }
 0x893   :  { %v1128_v55 = vpop.xlane.xlu2 %1127 }
 0x894   :  { %vm1129_vm2 = vcmp.eq.f32.partialorder %v1126_v46, %v1128_v55  ;;  %v1134_v62 = vcvt.f32.s32 %v1128_v55 }
 0x895   :  { %v1130_v57 = vsel %vm1129_vm2, %v1125_v56, inf }
 0x896   :  { %1131 = vmin.xlane.f32.xlu0 %v1130_v57  ;;  %v1135_v1 = vshll.u32 %v1134_v62, 16 }
 0x89b   :  { %v1087_v59 = vpop.permute.xlu2 %1086 }
 0x89c   :  { %v1093_v49 = vsel %vm1037_vm8, %v1087_v59, %v1091_v58 }
 0x89d   :  { %1111 = vperm.xlu2 %1616, %v1093_v49  }
 0x8a3   :  { %v1148_v8 = vpop.permute.xlu2 %1147 }
 0x8a4   :  { %v1150_v9 = vsel %vm1037_vm8, -inf, %v1148_v8  ;;  %v1098_v10 = vpop.permute.xlu1 %1097 }
 0x8a5   :  { %v1100_v12 = vsel %vm1094_vm9, %v1098_v10, 0.0 }
 0x8aa   :  { %1141 = vrot.lane.b32.xlu0 %v1137_v51, %s1791_s6 }
 0x8b2   :  { %1104 = vperm.xlu0 %1615, %v1063_v61  }
 0x8f7   :  { %v1112_v63 = vpop.permute.xlu2 %1111 }
 0x909   :  { %v1132_v0 = vpop.xlane.xlu0 %1131 }
 0x90a   :  { %v1133_v2 = vcvt.f32.s32 %v1132_v0 }
 0x90c   :  { %v1136_v3 = vadd.s32 %v1135_v1, %v1133_v2 }
 0x90e   :  { %v1138_v4 = vsel %vm1037_vm8, 2, %v1136_v3 }
 0x90f   :  { %v1139_v5 = vcvt.s32.f32 %v1138_v4 }
 0x911   :  { %1159 = vperm.xlu2 %1616, %v1139_v5  }
 0x91c   :  { %v1142_v6 = vpop.permute.xlu0 %1141 }
 0x91d   :  { %v1144_v7 = vsel %vm1037_vm8, -inf, %v1142_v6 }
 0x91e   :  { %1153 = vperm.xlu1 %1614, %v1144_v7  }
 0x924   :  { %v1105_v11 = vpop.permute.xlu0 %1104 }
 0x925   :  { %v1107_v14 = vsel %vm1101_vm10, %v1105_v11, %v1100_v12 }
 0x926   :  { %1166 = vperm.xlu1 %1614, %v1150_v9   ;;  %v1114_v15 = vsel %vm1108_vm11, %v1112_v63, %v1107_v14 }
 0x96b   :  { %v1160_v17 = vpop.permute.xlu2 %1159 }
 0x990   :  { %v1154_v13 = vpop.permute.xlu1 %1153 }
 0x991   :  { %v1156_v16 = vsel %vm1031_vm13, %v1154_v13, %v1114_v15 }
 0x992   :  { %v1162_v19 = vsel %vm1033_vm14, %v1160_v17, %v1156_v16 }
 0x998   :  { %v1167_v18 = vpop.permute.xlu1 %1166 }
 0x999   :  { %v1169_v20 = vsel %vm1163_vm12, %v1167_v18, %v1162_v19 }
 0x99a   :  { %1170 = vst [vmem:[#allocation9] sm:$0xf] %v1169_v20 }
 0x99b   :  { %1185 = dma.vmem_to_hbm [thread:$0]  %s1181_s15, 64, %s1183_s18, [#allocation6]  }
 0x99c   :  { %1778 = dma.done.wait [#allocation6], 64  }
 0x99d   :  { %1779 = vsyncadd [#allocation6], 4294967232 }
 0x99e   :  { %1780 = dma.done.wait [#allocation11], 64  }
 0x99f   :  { %1781 = vsyncadd [#allocation11], 4294967232 }
 0x9a0   :  { %1220 = vsyncpa [#allocation5], 1 }
 0x9a1   :  { %1221 = vsyncpa [#allocation8], 1 }
 0x9a2   :  { %1222 = vsyncpa [#allocation6], 1 }
 0x9a3   :  { %1223 = vsyncpa [#allocation11], 1 }

</bundles_post_ra>
